<compile_context>
chip_gen: v7x
topology: tpu7x:2x2x1
jax: 0.10.0
libtpu: 0.0.40
codegen_flags: <defaults>
</compile_context>

<pallas_src>
import jax
import jax.numpy as jnp
from jax.experimental import pallas as pl
from jax.experimental.pallas import tpu as pltpu

EPS = 1e-5        # DeepGGALayer / GGAConv eps
BN_EPS = 1e-5     # BatchNorm1d default eps
NORM_EPS = 1e-12  # F.normalize default eps


def _gga_conv(x, A_bf, w1_bf, gamma, beta, w2_bf, b2):
    """One GGAConv block on full VMEM-resident tiles.

    x is f32; A_bf / w1_bf / w2_bf are bf16 (MXU operands); accumulation in f32.
    The pre-BN bias is omitted (cancelled exactly by the BN mean subtraction).
    """
    # message + powermean(p=1): clamp -> mean (dense A matmul) -> clamp
    m = jnp.clip(jnp.maximum(x, 0.0) + EPS, 0.0, 100.0)
    agg = jnp.dot(A_bf, m.astype(jnp.bfloat16), preferred_element_type=jnp.float32)
    agg = jnp.clip(agg, 0.0, 100.0)
    # MessageNorm(learn_scale=False): normalize(agg, p=2, dim=-1) * ||x||_2
    inv_agg = jax.lax.rsqrt(
        jnp.maximum(jnp.sum(agg * agg, axis=-1, keepdims=True), NORM_EPS * NORM_EPS))
    x_l2 = jnp.sqrt(jnp.sum(x * x, axis=-1, keepdims=True))
    out = agg * (inv_agg * x_l2) + x
    # MLP([H, H, H]): Linear -> BatchNorm (batch stats) -> ReLU -> Linear
    h = jnp.dot(out.astype(jnp.bfloat16), w1_bf, preferred_element_type=jnp.float32)
    mu = jnp.mean(h, axis=0, keepdims=True)
    var = jnp.mean((h - mu) ** 2, axis=0, keepdims=True)
    h = gamma * (h - mu) * jax.lax.rsqrt(var + BN_EPS) + beta
    h = jnp.maximum(h, 0.0)
    return jnp.dot(h.astype(jnp.bfloat16), w2_bf, preferred_element_type=jnp.float32) + b2


def deep_gga_kernel(x_ref, a_ref,
                    w1_ref, g0_ref, bt0_ref, w2_ref, b2_ref,
                    w3_ref, g1_ref, bt1_ref, w4_ref, b4_ref,
                    we_ref, be_ref,
                    out_ref):
    x = x_ref[0]            # (N, HP) f32  (one graph)
    A = a_ref[0]            # (N, N)  bf16
    # block 0
    x1 = _gga_conv(x, A, w1_ref[...], g0_ref[...], bt0_ref[...], w2_ref[...], b2_ref[...])
    x1 = jnp.maximum(x1, 0.0) + EPS
    # block 1
    x2 = _gga_conv(x1, A, w3_ref[...], g1_ref[...], bt1_ref[...], w4_ref[...], b4_ref[...])
    xo = x + x2
    # exp_lin: MLP([H, 2H]) == single plain Linear, then relu + eps
    y = jnp.dot(xo.astype(jnp.bfloat16), we_ref[...],
                preferred_element_type=jnp.float32) + be_ref[...]
    out_ref[0] = jnp.maximum(y, 0.0) + EPS


def _round_up(v, m):
    return ((v + m - 1) // m) * m


def deep_gga_layer(x, A, p):
    """x: (B, N, H) f32, A: (B, N, N) f32 normalized adjacency, p: param dict.

    Returns (B, N, 2H) f32.  One fused pallas_call with a 'parallel' grid over the
    B independent graphs; feature dims padded to lane-dense widths inside.
    """
    B, N, H = x.shape
    HP = _round_up(max(H, 128), 128)        # lane-dense hidden width
    OP = _round_up(max(2 * H, 128), 128)    # lane-dense output width
    bf = jnp.bfloat16

    def pad_mat(w, rows, cols):
        return jnp.pad(w, ((0, rows - w.shape[0]), (0, cols - w.shape[1])))

    xp = jnp.pad(x, ((0, 0), (0, 0), (0, HP - H)))
    Ab = A.astype(bf)
    w1 = pad_mat(p["w1"], HP, HP).astype(bf)
    w2 = pad_mat(p["w2"], HP, HP).astype(bf)
    w3 = pad_mat(p["w3"], HP, HP).astype(bf)
    w4 = pad_mat(p["w4"], HP, HP).astype(bf)
    we = pad_mat(p["we"], HP, OP).astype(bf)
    g0 = pad_mat(p["g0"], 1, HP)
    bt0 = pad_mat(p["bt0"], 1, HP)
    g1 = pad_mat(p["g1"], 1, HP)
    bt1 = pad_mat(p["bt1"], 1, HP)
    b2 = pad_mat(p["b2"], 1, HP)
    b4 = pad_mat(p["b4"], 1, HP)
    be = pad_mat(p["be"], 1, OP)

    args = (xp, Ab, w1, g0, bt0, w2, b2, w3, g1, bt1, w4, b4, we, be)

    def per_graph(shape):
        return pl.BlockSpec(shape, lambda b: (b, 0, 0))

    def shared(shape):
        return pl.BlockSpec(shape, lambda b: (0,) * len(shape))

    in_specs = [
        per_graph((1, N, HP)),                                   # x
        per_graph((1, N, N)),                                    # A
        shared((HP, HP)), shared((1, HP)), shared((1, HP)),      # w1, g0, bt0
        shared((HP, HP)), shared((1, HP)),                       # w2, b2
        shared((HP, HP)), shared((1, HP)), shared((1, HP)),      # w3, g1, bt1
        shared((HP, HP)), shared((1, HP)),                       # w4, b4
        shared((HP, OP)), shared((1, OP)),                       # we, be
    ]
    out_spec = per_graph((1, N, OP))

    flops = int(B * (4 * N * N * HP + 8 * N * HP * HP + 2 * N * HP * OP))
    bytes_accessed = int(sum(a.size * a.dtype.itemsize for a in args) + B * N * OP * 4)
    cost = pl.CostEstimate(flops=flops,
                           transcendentals=int(B * (4 * N + 2 * HP)),
                           bytes_accessed=bytes_accessed)

    out = pl.pallas_call(
        deep_gga_kernel,
        out_shape=jax.ShapeDtypeStruct((B, N, OP), jnp.float32),
        grid=(B,),
        in_specs=in_specs,
        out_specs=out_spec,
        compiler_params=pltpu.CompilerParams(
            dimension_semantics=("parallel",),
            vmem_limit_bytes=32 * 1024 * 1024),
        cost_estimate=cost,
    )(*args)
    return out[:, :, : 2 * H]


def deep_gga_ref(x, A, p):
    """Pure-JAX reference with identical math (same bf16-in / f32-acc matmuls)."""
    bf = jnp.bfloat16
    w1, w2, w3, w4, we = (p[k].astype(bf) for k in ("w1", "w2", "w3", "w4", "we"))

    def one_graph(xg, Ag):
        x1 = _gga_conv(xg, Ag, w1, p["g0"], p["bt0"], w2, p["b2"])
        x1 = jnp.maximum(x1, 0.0) + EPS
        x2 = _gga_conv(x1, Ag, w3, p["g1"], p["bt1"], w4, p["b4"])
        xo = xg + x2
        y = jnp.dot(xo.astype(bf), we, preferred_element_type=jnp.float32) + p["be"]
        return jnp.maximum(y, 0.0) + EPS

    return jax.vmap(one_graph, in_axes=(0, 0))(x, A.astype(bf))


def init_params(key, H):
    ks = jax.random.split(key, 5)

    def lin(k, fin, fout):
        kw, kb = jax.random.split(k)
        w = jax.random.normal(kw, (fin, fout), jnp.float32) / jnp.sqrt(float(fin))
        b = jax.random.normal(kb, (1, fout), jnp.float32) * 0.01
        return w, b

    # Pre-BatchNorm biases (b1 / b3 of the conv MLPs) are omitted: with batch-stat BN
    # they are exactly cancelled by the mean subtraction, so they never affect outputs.
    w1, _ = lin(ks[0], H, H)
    w2, b2 = lin(ks[1], H, H)
    w3, _ = lin(ks[2], H, H)
    w4, b4 = lin(ks[3], H, H)
    we, be = lin(ks[4], H, 2 * H)
    return dict(
        w1=w1, g0=jnp.ones((1, H), jnp.float32), bt0=jnp.zeros((1, H), jnp.float32),
        w2=w2, b2=b2,
        w3=w3, g1=jnp.ones((1, H), jnp.float32), bt1=jnp.zeros((1, H), jnp.float32),
        w4=w4, b4=b4,
        we=we, be=be)


if __name__ == "__main__":
    key = jax.random.PRNGKey(0)
    kx, ke, kp = jax.random.split(key, 3)

    B, N, H, E = 2, 64, 32, 256     # graphs, nodes/graph, hidden_channels, edges/graph
    x = jax.random.normal(kx, (B, N, H), jnp.float32)
    edge_index = jax.random.randint(ke, (B, 2, E), 0, N)   # row 0 = src(j), row 1 = dst(i)

    # Normalized adjacency per graph: A[i, j] = (#edges j->i) / in_degree(i); empty rows -> 0.
    def build_adj(ei):
        src, dst = ei[0], ei[1]
        counts = jnp.zeros((N, N), jnp.float32).at[dst, src].add(1.0)
        indeg = counts.sum(axis=1, keepdims=True)
        return counts / jnp.maximum(indeg, 1.0)

    A = jax.vmap(build_adj)(edge_index)
    params = init_params(kp, H)

    out = deep_gga_layer(x, A, params)
    out = jax.block_until_ready(out)

    ref = deep_gga_ref(x, A, params)
    assert out.shape == (B, N, 2 * H), out.shape
    if not bool(jnp.allclose(out, ref, rtol=1e-3, atol=1e-3)):
        err = float(jnp.max(jnp.abs(out - ref)))
        raise AssertionError(f"Pallas kernel does not match JAX reference (max abs err {err})")

    print("KERNEL_OK")
</pallas_src>

<mosaic_0001>
module attributes {stable_mosaic.version = 11 : i64} {
  func.func @deep_gga_kernel(%arg0: i32, %arg1: memref<1x64x128xf32, #tpu.memory_space<vmem>>, %arg2: memref<1x64x64xbf16, #tpu.memory_space<vmem>>, %arg3: memref<128x128xbf16, #tpu.memory_space<vmem>>, %arg4: memref<1x128xf32, #tpu.memory_space<vmem>>, %arg5: memref<1x128xf32, #tpu.memory_space<vmem>>, %arg6: memref<128x128xbf16, #tpu.memory_space<vmem>>, %arg7: memref<1x128xf32, #tpu.memory_space<vmem>>, %arg8: memref<128x128xbf16, #tpu.memory_space<vmem>>, %arg9: memref<1x128xf32, #tpu.memory_space<vmem>>, %arg10: memref<1x128xf32, #tpu.memory_space<vmem>>, %arg11: memref<128x128xbf16, #tpu.memory_space<vmem>>, %arg12: memref<1x128xf32, #tpu.memory_space<vmem>>, %arg13: memref<128x128xbf16, #tpu.memory_space<vmem>>, %arg14: memref<1x128xf32, #tpu.memory_space<vmem>>, %arg15: memref<1x64x128xf32, #tpu.memory_space<vmem>>) attributes {dimension_semantics = [#tpu.dimension_semantics<parallel>], iteration_bounds = array<i64: 2>, scalar_prefetch = 0 : i64, scratch_operands = 0 : i64, tpu.core_type = #tpu.core_type<tc>, window_params = [{transform_indices = @transform_0, window_bounds = array<i64: 1, 64, 128>}, {transform_indices = @transform_1, window_bounds = array<i64: 1, 64, 64>}, {pipeline_mode = #tpu.pipeline_mode<synchronous>, transform_indices = @transform_2, window_bounds = array<i64: 128, 128>}, {pipeline_mode = #tpu.pipeline_mode<synchronous>, transform_indices = @transform_3, window_bounds = array<i64: 1, 128>}, {pipeline_mode = #tpu.pipeline_mode<synchronous>, transform_indices = @transform_4, window_bounds = array<i64: 1, 128>}, {pipeline_mode = #tpu.pipeline_mode<synchronous>, transform_indices = @transform_5, window_bounds = array<i64: 128, 128>}, {pipeline_mode = #tpu.pipeline_mode<synchronous>, transform_indices = @transform_6, window_bounds = array<i64: 1, 128>}, {pipeline_mode = #tpu.pipeline_mode<synchronous>, transform_indices = @transform_7, window_bounds = array<i64: 128, 128>}, {pipeline_mode = #tpu.pipeline_mode<synchronous>, transform_indices = @transform_8, window_bounds = array<i64: 1, 128>}, {pipeline_mode = #tpu.pipeline_mode<synchronous>, transform_indices = @transform_9, window_bounds = array<i64: 1, 128>}, {pipeline_mode = #tpu.pipeline_mode<synchronous>, transform_indices = @transform_10, window_bounds = array<i64: 128, 128>}, {pipeline_mode = #tpu.pipeline_mode<synchronous>, transform_indices = @transform_11, window_bounds = array<i64: 1, 128>}, {pipeline_mode = #tpu.pipeline_mode<synchronous>, transform_indices = @transform_12, window_bounds = array<i64: 128, 128>}, {pipeline_mode = #tpu.pipeline_mode<synchronous>, transform_indices = @transform_13, window_bounds = array<i64: 1, 128>}, {transform_indices = @transform_14, window_bounds = array<i64: 1, 64, 128>}]} {
    %c0 = arith.constant 0 : index
    %c0_0 = arith.constant 0 : index
    %c0_1 = arith.constant 0 : index
    %0 = vector.load %arg1[%c0, %c0_0, %c0_1] : memref<1x64x128xf32, #tpu.memory_space<vmem>>, vector<1x64x128xf32>
    %1 = vector.shape_cast %0 : vector<1x64x128xf32> to vector<64x128xf32>
    %c0_2 = arith.constant 0 : index
    %c0_3 = arith.constant 0 : index
    %c0_4 = arith.constant 0 : index
    %2 = vector.load %arg2[%c0_2, %c0_3, %c0_4] : memref<1x64x64xbf16, #tpu.memory_space<vmem>>, vector<1x64x64xbf16>
    %3 = vector.shape_cast %2 : vector<1x64x64xbf16> to vector<64x64xbf16>
    %c0_5 = arith.constant 0 : index
    %c0_6 = arith.constant 0 : index
    %4 = vector.load %arg3[%c0_5, %c0_6] : memref<128x128xbf16, #tpu.memory_space<vmem>>, vector<128x128xbf16>
    %c0_7 = arith.constant 0 : index
    %c0_8 = arith.constant 0 : index
    %5 = vector.load %arg4[%c0_7, %c0_8] : memref<1x128xf32, #tpu.memory_space<vmem>>, vector<1x128xf32>
    %c0_9 = arith.constant 0 : index
    %c0_10 = arith.constant 0 : index
    %6 = vector.load %arg5[%c0_9, %c0_10] : memref<1x128xf32, #tpu.memory_space<vmem>>, vector<1x128xf32>
    %c0_11 = arith.constant 0 : index
    %c0_12 = arith.constant 0 : index
    %7 = vector.load %arg6[%c0_11, %c0_12] : memref<128x128xbf16, #tpu.memory_space<vmem>>, vector<128x128xbf16>
    %c0_13 = arith.constant 0 : index
    %c0_14 = arith.constant 0 : index
    %8 = vector.load %arg7[%c0_13, %c0_14] : memref<1x128xf32, #tpu.memory_space<vmem>>, vector<1x128xf32>
    %cst = arith.constant 0.000000e+00 : f32
    %9 = vector.broadcast %cst : f32 to vector<64x128xf32>
    %10 = arith.maximumf %1, %9 : vector<64x128xf32>
    %cst_15 = arith.constant 9.99999974E-6 : f32
    %11 = vector.broadcast %cst_15 : f32 to vector<64x128xf32>
    %12 = arith.addf %10, %11 : vector<64x128xf32>
    %cst_16 = arith.constant 0.000000e+00 : f32
    %cst_17 = arith.constant 1.000000e+02 : f32
    %13 = vector.broadcast %cst_16 : f32 to vector<64x128xf32>
    %14 = arith.maximumf %13, %12 : vector<64x128xf32>
    %15 = vector.broadcast %cst_17 : f32 to vector<64x128xf32>
    %16 = arith.minimumf %15, %14 : vector<64x128xf32>
    %17 = arith.truncf %16 : vector<64x128xf32> to vector<64x128xbf16>
    %cst_18 = arith.constant dense<0.000000e+00> : vector<64x128xf32>
    %18 = tpu.matmul %3, %17, %cst_18 {dimension_numbers = #tpu.dot_dimension_numbers<[1], [0], [0], [1], [0, 0, 1, 1], [], []>} : vector<64x64xbf16>, vector<64x128xbf16>, vector<64x128xf32> -> vector<64x128xf32>
    %cst_19 = arith.constant 0.000000e+00 : f32
    %cst_20 = arith.constant 1.000000e+02 : f32
    %19 = vector.broadcast %cst_19 : f32 to vector<64x128xf32>
    %20 = arith.maximumf %19, %18 : vector<64x128xf32>
    %21 = vector.broadcast %cst_20 : f32 to vector<64x128xf32>
    %22 = arith.minimumf %21, %20 : vector<64x128xf32>
    %23 = arith.mulf %22, %22 : vector<64x128xf32>
    %cst_21 = arith.constant dense<0.000000e+00> : vector<64xf32>
    %24 = vector.multi_reduction <add>, %23, %cst_21 [1] : vector<64x128xf32> to vector<64xf32>
    %25 = vector.shape_cast %24 : vector<64xf32> to vector<64x1xf32>
    %cst_22 = arith.constant 1.000000e-24 : f32
    %26 = vector.broadcast %cst_22 : f32 to vector<64x1xf32>
    %27 = arith.maximumf %25, %26 : vector<64x1xf32>
    %28 = math.rsqrt %27 : vector<64x1xf32>
    %29 = arith.mulf %1, %1 : vector<64x128xf32>
    %cst_23 = arith.constant dense<0.000000e+00> : vector<64xf32>
    %30 = vector.multi_reduction <add>, %29, %cst_23 [1] : vector<64x128xf32> to vector<64xf32>
    %31 = vector.shape_cast %30 : vector<64xf32> to vector<64x1xf32>
    %32 = math.sqrt %31 : vector<64x1xf32>
    %33 = arith.mulf %28, %32 : vector<64x1xf32>
    %34 = vector.broadcast %33 : vector<64x1xf32> to vector<64x128xf32>
    %35 = arith.mulf %22, %34 : vector<64x128xf32>
    %36 = arith.addf %35, %1 : vector<64x128xf32>
    %37 = arith.truncf %36 : vector<64x128xf32> to vector<64x128xbf16>
    %cst_24 = arith.constant dense<0.000000e+00> : vector<64x128xf32>
    %38 = tpu.matmul %37, %4, %cst_24 {dimension_numbers = #tpu.dot_dimension_numbers<[1], [0], [0], [1], [0, 0, 1, 1], [], []>} : vector<64x128xbf16>, vector<128x128xbf16>, vector<64x128xf32> -> vector<64x128xf32>
    %cst_25 = arith.constant dense<0.000000e+00> : vector<128xf32>
    %39 = vector.multi_reduction <add>, %38, %cst_25 [0] : vector<64x128xf32> to vector<128xf32>
    %40 = vector.shape_cast %39 : vector<128xf32> to vector<1x128xf32>
    %cst_26 = arith.constant 6.400000e+01 : f32
    %41 = vector.broadcast %cst_26 : f32 to vector<1x128xf32>
    %42 = arith.divf %40, %41 : vector<1x128xf32>
    %43 = vector.broadcast %42 : vector<1x128xf32> to vector<64x128xf32>
    %44 = arith.subf %38, %43 : vector<64x128xf32>
    %45 = arith.mulf %44, %44 : vector<64x128xf32>
    %cst_27 = arith.constant dense<0.000000e+00> : vector<128xf32>
    %46 = vector.multi_reduction <add>, %45, %cst_27 [0] : vector<64x128xf32> to vector<128xf32>
    %47 = vector.shape_cast %46 : vector<128xf32> to vector<1x128xf32>
    %cst_28 = arith.constant 6.400000e+01 : f32
    %48 = vector.broadcast %cst_28 : f32 to vector<1x128xf32>
    %49 = arith.divf %47, %48 : vector<1x128xf32>
    %50 = vector.broadcast %42 : vector<1x128xf32> to vector<64x128xf32>
    %51 = arith.subf %38, %50 : vector<64x128xf32>
    %52 = vector.broadcast %5 : vector<1x128xf32> to vector<64x128xf32>
    %53 = arith.mulf %52, %51 : vector<64x128xf32>
    %cst_29 = arith.constant 9.99999974E-6 : f32
    %54 = vector.broadcast %cst_29 : f32 to vector<1x128xf32>
    %55 = arith.addf %49, %54 : vector<1x128xf32>
    %56 = math.rsqrt %55 : vector<1x128xf32>
    %57 = vector.broadcast %56 : vector<1x128xf32> to vector<64x128xf32>
    %58 = arith.mulf %53, %57 : vector<64x128xf32>
    %59 = vector.broadcast %6 : vector<1x128xf32> to vector<64x128xf32>
    %60 = arith.addf %58, %59 : vector<64x128xf32>
    %cst_30 = arith.constant 0.000000e+00 : f32
    %61 = vector.broadcast %cst_30 : f32 to vector<64x128xf32>
    %62 = arith.maximumf %60, %61 : vector<64x128xf32>
    %63 = arith.truncf %62 : vector<64x128xf32> to vector<64x128xbf16>
    %cst_31 = arith.constant dense<0.000000e+00> : vector<64x128xf32>
    %64 = tpu.matmul %63, %7, %cst_31 {dimension_numbers = #tpu.dot_dimension_numbers<[1], [0], [0], [1], [0, 0, 1, 1], [], []>} : vector<64x128xbf16>, vector<128x128xbf16>, vector<64x128xf32> -> vector<64x128xf32>
    %65 = vector.broadcast %8 : vector<1x128xf32> to vector<64x128xf32>
    %66 = arith.addf %64, %65 : vector<64x128xf32>
    %cst_32 = arith.constant 0.000000e+00 : f32
    %67 = vector.broadcast %cst_32 : f32 to vector<64x128xf32>
    %68 = arith.maximumf %66, %67 : vector<64x128xf32>
    %cst_33 = arith.constant 9.99999974E-6 : f32
    %69 = vector.broadcast %cst_33 : f32 to vector<64x128xf32>
    %70 = arith.addf %68, %69 : vector<64x128xf32>
    %c0_34 = arith.constant 0 : index
    %c0_35 = arith.constant 0 : index
    %71 = vector.load %arg8[%c0_34, %c0_35] : memref<128x128xbf16, #tpu.memory_space<vmem>>, vector<128x128xbf16>
    %c0_36 = arith.constant 0 : index
    %c0_37 = arith.constant 0 : index
    %72 = vector.load %arg9[%c0_36, %c0_37] : memref<1x128xf32, #tpu.memory_space<vmem>>, vector<1x128xf32>
    %c0_38 = arith.constant 0 : index
    %c0_39 = arith.constant 0 : index
    %73 = vector.load %arg10[%c0_38, %c0_39] : memref<1x128xf32, #tpu.memory_space<vmem>>, vector<1x128xf32>
    %c0_40 = arith.constant 0 : index
    %c0_41 = arith.constant 0 : index
    %74 = vector.load %arg11[%c0_40, %c0_41] : memref<128x128xbf16, #tpu.memory_space<vmem>>, vector<128x128xbf16>
    %c0_42 = arith.constant 0 : index
    %c0_43 = arith.constant 0 : index
    %75 = vector.load %arg12[%c0_42, %c0_43] : memref<1x128xf32, #tpu.memory_space<vmem>>, vector<1x128xf32>
    %cst_44 = arith.constant 0.000000e+00 : f32
    %76 = vector.broadcast %cst_44 : f32 to vector<64x128xf32>
    %77 = arith.maximumf %70, %76 : vector<64x128xf32>
    %cst_45 = arith.constant 9.99999974E-6 : f32
    %78 = vector.broadcast %cst_45 : f32 to vector<64x128xf32>
    %79 = arith.addf %77, %78 : vector<64x128xf32>
    %cst_46 = arith.constant 0.000000e+00 : f32
    %cst_47 = arith.constant 1.000000e+02 : f32
    %80 = vector.broadcast %cst_46 : f32 to vector<64x128xf32>
    %81 = arith.maximumf %80, %79 : vector<64x128xf32>
    %82 = vector.broadcast %cst_47 : f32 to vector<64x128xf32>
    %83 = arith.minimumf %82, %81 : vector<64x128xf32>
    %84 = arith.truncf %83 : vector<64x128xf32> to vector<64x128xbf16>
    %cst_48 = arith.constant dense<0.000000e+00> : vector<64x128xf32>
    %85 = tpu.matmul %3, %84, %cst_48 {dimension_numbers = #tpu.dot_dimension_numbers<[1], [0], [0], [1], [0, 0, 1, 1], [], []>} : vector<64x64xbf16>, vector<64x128xbf16>, vector<64x128xf32> -> vector<64x128xf32>
    %cst_49 = arith.constant 0.000000e+00 : f32
    %cst_50 = arith.constant 1.000000e+02 : f32
    %86 = vector.broadcast %cst_49 : f32 to vector<64x128xf32>
    %87 = arith.maximumf %86, %85 : vector<64x128xf32>
    %88 = vector.broadcast %cst_50 : f32 to vector<64x128xf32>
    %89 = arith.minimumf %88, %87 : vector<64x128xf32>
    %90 = arith.mulf %89, %89 : vector<64x128xf32>
    %cst_51 = arith.constant dense<0.000000e+00> : vector<64xf32>
    %91 = vector.multi_reduction <add>, %90, %cst_51 [1] : vector<64x128xf32> to vector<64xf32>
    %92 = vector.shape_cast %91 : vector<64xf32> to vector<64x1xf32>
    %cst_52 = arith.constant 1.000000e-24 : f32
    %93 = vector.broadcast %cst_52 : f32 to vector<64x1xf32>
    %94 = arith.maximumf %92, %93 : vector<64x1xf32>
    %95 = math.rsqrt %94 : vector<64x1xf32>
    %96 = arith.mulf %70, %70 : vector<64x128xf32>
    %cst_53 = arith.constant dense<0.000000e+00> : vector<64xf32>
    %97 = vector.multi_reduction <add>, %96, %cst_53 [1] : vector<64x128xf32> to vector<64xf32>
    %98 = vector.shape_cast %97 : vector<64xf32> to vector<64x1xf32>
    %99 = math.sqrt %98 : vector<64x1xf32>
    %100 = arith.mulf %95, %99 : vector<64x1xf32>
    %101 = vector.broadcast %100 : vector<64x1xf32> to vector<64x128xf32>
    %102 = arith.mulf %89, %101 : vector<64x128xf32>
    %103 = arith.addf %102, %70 : vector<64x128xf32>
    %104 = arith.truncf %103 : vector<64x128xf32> to vector<64x128xbf16>
    %cst_54 = arith.constant dense<0.000000e+00> : vector<64x128xf32>
    %105 = tpu.matmul %104, %71, %cst_54 {dimension_numbers = #tpu.dot_dimension_numbers<[1], [0], [0], [1], [0, 0, 1, 1], [], []>} : vector<64x128xbf16>, vector<128x128xbf16>, vector<64x128xf32> -> vector<64x128xf32>
    %cst_55 = arith.constant dense<0.000000e+00> : vector<128xf32>
    %106 = vector.multi_reduction <add>, %105, %cst_55 [0] : vector<64x128xf32> to vector<128xf32>
    %107 = vector.shape_cast %106 : vector<128xf32> to vector<1x128xf32>
    %cst_56 = arith.constant 6.400000e+01 : f32
    %108 = vector.broadcast %cst_56 : f32 to vector<1x128xf32>
    %109 = arith.divf %107, %108 : vector<1x128xf32>
    %110 = vector.broadcast %109 : vector<1x128xf32> to vector<64x128xf32>
    %111 = arith.subf %105, %110 : vector<64x128xf32>
    %112 = arith.mulf %111, %111 : vector<64x128xf32>
    %cst_57 = arith.constant dense<0.000000e+00> : vector<128xf32>
    %113 = vector.multi_reduction <add>, %112, %cst_57 [0] : vector<64x128xf32> to vector<128xf32>
    %114 = vector.shape_cast %113 : vector<128xf32> to vector<1x128xf32>
    %cst_58 = arith.constant 6.400000e+01 : f32
    %115 = vector.broadcast %cst_58 : f32 to vector<1x128xf32>
    %116 = arith.divf %114, %115 : vector<1x128xf32>
    %117 = vector.broadcast %109 : vector<1x128xf32> to vector<64x128xf32>
    %118 = arith.subf %105, %117 : vector<64x128xf32>
    %119 = vector.broadcast %72 : vector<1x128xf32> to vector<64x128xf32>
    %120 = arith.mulf %119, %118 : vector<64x128xf32>
    %cst_59 = arith.constant 9.99999974E-6 : f32
    %121 = vector.broadcast %cst_59 : f32 to vector<1x128xf32>
    %122 = arith.addf %116, %121 : vector<1x128xf32>
    %123 = math.rsqrt %122 : vector<1x128xf32>
    %124 = vector.broadcast %123 : vector<1x128xf32> to vector<64x128xf32>
    %125 = arith.mulf %120, %124 : vector<64x128xf32>
    %126 = vector.broadcast %73 : vector<1x128xf32> to vector<64x128xf32>
    %127 = arith.addf %125, %126 : vector<64x128xf32>
    %cst_60 = arith.constant 0.000000e+00 : f32
    %128 = vector.broadcast %cst_60 : f32 to vector<64x128xf32>
    %129 = arith.maximumf %127, %128 : vector<64x128xf32>
    %130 = arith.truncf %129 : vector<64x128xf32> to vector<64x128xbf16>
    %cst_61 = arith.constant dense<0.000000e+00> : vector<64x128xf32>
    %131 = tpu.matmul %130, %74, %cst_61 {dimension_numbers = #tpu.dot_dimension_numbers<[1], [0], [0], [1], [0, 0, 1, 1], [], []>} : vector<64x128xbf16>, vector<128x128xbf16>, vector<64x128xf32> -> vector<64x128xf32>
    %132 = vector.broadcast %75 : vector<1x128xf32> to vector<64x128xf32>
    %133 = arith.addf %131, %132 : vector<64x128xf32>
    %134 = arith.addf %1, %133 : vector<64x128xf32>
    %135 = arith.truncf %134 : vector<64x128xf32> to vector<64x128xbf16>
    %c0_62 = arith.constant 0 : index
    %c0_63 = arith.constant 0 : index
    %136 = vector.load %arg13[%c0_62, %c0_63] : memref<128x128xbf16, #tpu.memory_space<vmem>>, vector<128x128xbf16>
    %cst_64 = arith.constant dense<0.000000e+00> : vector<64x128xf32>
    %137 = tpu.matmul %135, %136, %cst_64 {dimension_numbers = #tpu.dot_dimension_numbers<[1], [0], [0], [1], [0, 0, 1, 1], [], []>} : vector<64x128xbf16>, vector<128x128xbf16>, vector<64x128xf32> -> vector<64x128xf32>
    %c0_65 = arith.constant 0 : index
    %c0_66 = arith.constant 0 : index
    %138 = vector.load %arg14[%c0_65, %c0_66] : memref<1x128xf32, #tpu.memory_space<vmem>>, vector<1x128xf32>
    %139 = vector.broadcast %138 : vector<1x128xf32> to vector<64x128xf32>
    %140 = arith.addf %137, %139 : vector<64x128xf32>
    %cst_67 = arith.constant 0.000000e+00 : f32
    %141 = vector.broadcast %cst_67 : f32 to vector<64x128xf32>
    %142 = arith.maximumf %140, %141 : vector<64x128xf32>
    %cst_68 = arith.constant 9.99999974E-6 : f32
    %143 = vector.broadcast %cst_68 : f32 to vector<64x128xf32>
    %144 = arith.addf %142, %143 : vector<64x128xf32>
    %c0_69 = arith.constant 0 : index
    %c0_70 = arith.constant 0 : index
    %c0_71 = arith.constant 0 : index
    %145 = vector.load %arg15[%c0_69, %c0_70, %c0_71] : memref<1x64x128xf32, #tpu.memory_space<vmem>>, vector<1x64x128xf32>
    %146 = vector.shape_cast %145 : vector<1x64x128xf32> to vector<64x128xf32>
    %147 = vector.shape_cast %144 : vector<64x128xf32> to vector<1x64x128xf32>
    tpu.vector_store %arg15[%c0_69, %c0_70, %c0_71], %147 {strides = array<i32>} : memref<1x64x128xf32, #tpu.memory_space<vmem>>, vector<1x64x128xf32>,
    return
  }
  func.func @transform_0(%arg0: i32) -> (i32, i32, i32) {
    %c0_i32 = arith.constant 0 : i32
    %c0_i32_0 = arith.constant 0 : i32
    %c0_i32_1 = arith.constant 0 : i32
    return %arg0, %c0_i32, %c0_i32_0 : i32, i32, i32
  }
  func.func @transform_1(%arg0: i32) -> (i32, i32, i32) {
    %c0_i32 = arith.constant 0 : i32
    %c0_i32_0 = arith.constant 0 : i32
    %c0_i32_1 = arith.constant 0 : i32
    return %arg0, %c0_i32, %c0_i32_0 : i32, i32, i32
  }
  func.func @transform_2(%arg0: i32) -> (i32, i32) {
    %c0_i32 = arith.constant 0 : i32
    %c0_i32_0 = arith.constant 0 : i32
    %c0_i32_1 = arith.constant 0 : i32
    return %c0_i32, %c0_i32_0 : i32, i32
  }
  func.func @transform_3(%arg0: i32) -> (i32, i32) {
    %c0_i32 = arith.constant 0 : i32
    %c0_i32_0 = arith.constant 0 : i32
    %c0_i32_1 = arith.constant 0 : i32
    return %c0_i32, %c0_i32_0 : i32, i32
  }
  func.func @transform_4(%arg0: i32) -> (i32, i32) {
    %c0_i32 = arith.constant 0 : i32
    %c0_i32_0 = arith.constant 0 : i32
    %c0_i32_1 = arith.constant 0 : i32
    return %c0_i32, %c0_i32_0 : i32, i32
  }
  func.func @transform_5(%arg0: i32) -> (i32, i32) {
    %c0_i32 = arith.constant 0 : i32
    %c0_i32_0 = arith.constant 0 : i32
    %c0_i32_1 = arith.constant 0 : i32
    return %c0_i32, %c0_i32_0 : i32, i32
  }
  func.func @transform_6(%arg0: i32) -> (i32, i32) {
    %c0_i32 = arith.constant 0 : i32
    %c0_i32_0 = arith.constant 0 : i32
    %c0_i32_1 = arith.constant 0 : i32
    return %c0_i32, %c0_i32_0 : i32, i32
  }
  func.func @transform_7(%arg0: i32) -> (i32, i32) {
    %c0_i32 = arith.constant 0 : i32
    %c0_i32_0 = arith.constant 0 : i32
    %c0_i32_1 = arith.constant 0 : i32
    return %c0_i32, %c0_i32_0 : i32, i32
  }
  func.func @transform_8(%arg0: i32) -> (i32, i32) {
    %c0_i32 = arith.constant 0 : i32
    %c0_i32_0 = arith.constant 0 : i32
    %c0_i32_1 = arith.constant 0 : i32
    return %c0_i32, %c0_i32_0 : i32, i32
  }
  func.func @transform_9(%arg0: i32) -> (i32, i32) {
    %c0_i32 = arith.constant 0 : i32
    %c0_i32_0 = arith.constant 0 : i32
    %c0_i32_1 = arith.constant 0 : i32
    return %c0_i32, %c0_i32_0 : i32, i32
  }
  func.func @transform_10(%arg0: i32) -> (i32, i32) {
    %c0_i32 = arith.constant 0 : i32
    %c0_i32_0 = arith.constant 0 : i32
    %c0_i32_1 = arith.constant 0 : i32
    return %c0_i32, %c0_i32_0 : i32, i32
  }
  func.func @transform_11(%arg0: i32) -> (i32, i32) {
    %c0_i32 = arith.constant 0 : i32
    %c0_i32_0 = arith.constant 0 : i32
    %c0_i32_1 = arith.constant 0 : i32
    return %c0_i32, %c0_i32_0 : i32, i32
  }
  func.func @transform_12(%arg0: i32) -> (i32, i32) {
    %c0_i32 = arith.constant 0 : i32
    %c0_i32_0 = arith.constant 0 : i32
    %c0_i32_1 = arith.constant 0 : i32
    return %c0_i32, %c0_i32_0 : i32, i32
  }
  func.func @transform_13(%arg0: i32) -> (i32, i32) {
    %c0_i32 = arith.constant 0 : i32
    %c0_i32_0 = arith.constant 0 : i32
    %c0_i32_1 = arith.constant 0 : i32
    return %c0_i32, %c0_i32_0 : i32, i32
  }
  func.func @transform_14(%arg0: i32) -> (i32, i32, i32) {
    %c0_i32 = arith.constant 0 : i32
    %c0_i32_0 = arith.constant 0 : i32
    %c0_i32_1 = arith.constant 0 : i32
    return %arg0, %c0_i32, %c0_i32_0 : i32, i32, i32
  }
}

</mosaic_0001>

<bundles_post_ra>
// kernel: tpu_custom_call.1
= control target key start
LH: loop header
LB: loop body
LE: loop exit
PB: predicated region body
PF: predicated region fallthrough
CT: control target
= control target key end

     0   :  { %s3904_s0 = inlined_call_operand.hbm [shape: f32[2,64,128], index: 0, kind: input, shape index: {}]   ;;  %s3905_s1 = inlined_call_operand.hbm [shape: bf16[2,64,64], index: 1, kind: input, shape index: {}]   ;;  %s3906_s2 = inlined_call_operand.hbm [shape: bf16[128,128], index: 2, kind: input, shape index: {}]   ;;  %s3907_s3 = inlined_call_operand.vmem [shape: f32[1,128], index: 3, kind: input, shape index: {}]   ;;  %s3908_s4 = inlined_call_operand.vmem [shape: f32[1,128], index: 4, kind: input, shape index: {}]   ;;  %s3909_s5 = inlined_call_operand.hbm [shape: bf16[128,128], index: 5, kind: input, shape index: {}]   ;;  %s3910_s6 = inlined_call_operand.vmem [shape: f32[1,128], index: 6, kind: input, shape index: {}]   ;;  %s3911_s7 = inlined_call_operand.hbm [shape: bf16[128,128], index: 7, kind: input, shape index: {}]   ;;  %s3912_s8 = inlined_call_operand.vmem [shape: f32[1,128], index: 8, kind: input, shape index: {}]   ;;  %s3913_s9 = inlined_call_operand.vmem [shape: f32[1,128], index: 9, kind: input, shape index: {}]   ;;  %s3914_s10 = inlined_call_operand.hbm [shape: bf16[128,128], index: 10, kind: input, shape index: {}]   ;;  %s3915_s11 = inlined_call_operand.vmem [shape: f32[1,128], index: 11, kind: input, shape index: {}]   ;;  %s3916_s12 = inlined_call_operand.hbm [shape: bf16[128,128], index: 12, kind: input, shape index: {}]   ;;  %s3917_s13 = inlined_call_operand.vmem [shape: f32[1,128], index: 13, kind: input, shape index: {}]   ;;  %s3918_s14 = inlined_call_operand.hbm [shape: f32[2,64,128], index: 14, kind: output, shape index: {}]  }
   0x1   :  { %3925 = sst [smem:[#allocation21_spill]] %s3904_s0 }
   0x2   :  { %3926 = sst [smem:[#allocation22_spill]] %s3906_s2 }
   0x3   :  { %3927 = sst [smem:[#allocation23_spill]] %s3909_s5 }
   0x4   :  { %3928 = sst [smem:[#allocation24_spill]] %s3910_s6 }
   0x5   :  { %3929 = sst [smem:[#allocation25_spill]] %s3911_s7 }
   0x6   :  { %3930 = sst [smem:[#allocation26_spill]] %s3912_s8 }
   0x7   :  { %3931 = sst [smem:[#allocation27_spill]] %s3913_s9 }
   0x8   :  { %3932 = sst [smem:[#allocation28_spill]] %s3914_s10 }
   0x9   :  { %3933 = sst [smem:[#allocation29_spill]] %s3915_s11 }
   0xa   :  { %3934 = sst [smem:[#allocation30_spill]] %s3916_s12 }
   0xb   :  { %3935 = sst [smem:[#allocation31_spill]] %s3917_s13 }
   0xc   :  { %3936 = sst [smem:[#allocation32_spill]] %s3918_s14 }
   0xd   :  { %19 = vsyncpa [#allocation3], 0 }
   0xe   :  { %21 = vsyncpa [#allocation3 + $0x1], 0 }
   0xf   :  { %22 = vsyncpa [#allocation6], 0 }
  0x10   :  { %24 = vsyncpa [#allocation6 + $0x1], 0 }
  0x11   :  { %25 = vsyncpa [#allocation9], 0 }
  0x12   :  { %26 = vsyncpa [#allocation12], 0 }
  0x13   :  { %27 = vsyncpa [#allocation4], 0 }
  0x14   :  { %29 = vsyncpa [#allocation4 + $0x1], 0  ;;  %s3165_s29 = smov 0   ;;  %s3167_s30 = smov 0  }
  0x15   :  { %s3169_s15 = smov 0   ;;  %s3171_s16 = smov 0  }
  0x16 LB: > { %s3076_s17 = smov [#allocation7]   ;;  %s3186_s19 = sadd.s32 4294967295, %s3074_s16   ;;  %s3074_s16 = sphi %s3171_s16, %s3972_s16   ;;  %s3070_s15 = sphi %s3169_s15, %s3971_s15   ;;  %s3066_s30 = sphi %s3167_s30, %s3970_s30   ;;  %s3062_s29 = sphi %s3165_s29, %s3969_s29  }
  0x17   : > { %s382_s18 = sshll.u32 %s3076_s17, 4  ;;  %p2247_p0 = scmp.ge.s32.totalorder %s3074_s16, 1  ;;  %s3191_s18 = int_to_ptr.vmem [resolvable:$true] %s382_s18 }
  0x18   : > { %p3920_p1 = scmp.eq.s32.totalorder %s3186_s19, 0  ;;  %p370_p2 = scmp.lt.s32.totalorder %s3074_s16, 3 }
  0x19   : > { %s3077_s21 = smov [#allocation8]   ;;  %s3078_s24 = smov [#allocation11]  }
  0x1a   : > { %p3193_p3 = pnand %p2247_p0, %p370_p2  ;;  %s401_s22 = sshll.u32 %s3077_s21, 4  ;;  %s3206_s22 = int_to_ptr.vmem [resolvable:$true] %s401_s22 }
  0x1b   : > { %s436_s25 = sshll.u32 %s3078_s24, 4  ;;  %s3939_s2 = sld [smem:[#allocation22_spill]]  ;;  %s3208_s25 = int_to_ptr.vmem [resolvable:$true] %s436_s25 }
  0x1c   : > { %s3937_s20 = scalar_select %p3193_p3, 1, 0 }
  0x1d   : > { %p2590_p5 = pneg %p3193_p3 }
  0x1f   : > { %p3202_p6 = pnand %p2590_p5, %p3920_p1 }
  0x21   : > { %s2792_s28 = scalar_lea.hbm %s3939_s2, 1024  ;;  %p3218_p8 = pneg %p3202_p6 }
  0x22   : > { %p2793_p7 = scmp.ne.s32.totalorder %s3939_s2, %s2792_s28  ;;  %p2799_p11 = scmp.lt.u32.totalorder %s2792_s28, %s3939_s2 }
  0x24   : > { %p2795_p9 = pnand %p3218_p8, %p2793_p7 }
  0x26   : > { %p2796_p10 = pneg %p2795_p9 }
  0x28   : > { %p2801_p12 = pnand %p2799_p11, %p2796_p10 }
  0x2a   : > { %2804 = shalt.err (!%p2801_p12)
}
  0x2b   : > { %s2805_s14 = scalar_lea.vmem %s3191_s18, 1024  ;;  %p2813_p5 = scmp.lt.s32.totalorder %s3191_s18, %s3191_s18 }
  0x2c   : > { %p2806_p13 = scmp.ne.s32.totalorder %s3191_s18, %s2805_s14  ;;  %p2814_p4 = scmp.lt.s32.totalorder %s2805_s14, %s2805_s14 }
  0x2e   : > { %p2808_p0 = pnand %p2806_p13, %p3218_p8  ;;  %p2815_p7 = por %p2814_p4, %p2813_p5 }
  0x30   : > { %p2809_p2 = pneg %p2808_p0 }
  0x32   : > { %p2816_p9 = pnand %p2815_p7, %p2809_p2 }
  0x34   : > { %2819 = shalt.err (!%p2816_p9)
}
  0x35   : > { %s3922_s26 = smov 64   ;;  %s3923_s13 = smov 4  }
  0x36   : > { %2593 = dma.hbm_to_vmem [thread:$0]  (!%p3202_p6), %s3939_s2, 1024, %s3191_s18, [#allocation6], %s3922_s26, %s3922_s26, %s3923_s13  }
  0x37   : > { %s3941_s5 = sld [smem:[#allocation23_spill]] }
  0x3d   : > { %s2820_s14 = scalar_lea.hbm %s3941_s5, 1024 }
  0x3e   : > { %p2821_p4 = scmp.ne.s32.totalorder %s3941_s5, %s2820_s14  ;;  %p2827_p12 = scmp.lt.u32.totalorder %s2820_s14, %s3941_s5 }
  0x40   : > { %p2823_p10 = pnand %p2821_p4, %p3218_p8 }
  0x42   : > { %p2824_p11 = pneg %p2823_p10 }
  0x44   : > { %p2829_p13 = pnand %p2827_p12, %p2824_p11 }
  0x46   : > { %2832 = shalt.err (!%p2829_p13)
}
  0x47   : > { %s2833_s18 = scalar_lea.vmem %s3206_s22, 1024  ;;  %p2841_p7 = scmp.lt.s32.totalorder %s3206_s22, %s3206_s22 }
  0x48   : > { %p2834_p0 = scmp.ne.s32.totalorder %s3206_s22, %s2833_s18  ;;  %p2842_p9 = scmp.lt.s32.totalorder %s2833_s18, %s2833_s18 }
  0x4a   : > { %p2836_p2 = pnand %p2834_p0, %p3218_p8  ;;  %p2843_p4 = por %p2842_p9, %p2841_p7 }
  0x4c   : > { %p2837_p5 = pneg %p2836_p2 }
  0x4e   : > { %p2844_p10 = pnand %p2843_p4, %p2837_p5 }
  0x50   : > { %2847 = shalt.err (!%p2844_p10)
}
  0x51   : > { %2596 = dma.hbm_to_vmem [thread:$0]  (!%p3202_p6), %s3941_s5, 1024, %s3206_s22, [#allocation9], %s3922_s26, %s3922_s26, %s3923_s13  }
  0x52   : > { %s3942_s10 = sld [smem:[#allocation28_spill]] }
  0x58   : > { %s2848_s27 = scalar_lea.hbm %s3942_s10, 1024 }
  0x59   : > { %p2849_p11 = scmp.ne.s32.totalorder %s3942_s10, %s2848_s27  ;;  %p2855_p0 = scmp.lt.u32.totalorder %s2848_s27, %s3942_s10 }
  0x5b   : > { %p2851_p12 = pnand %p2849_p11, %p3218_p8 }
  0x5d   : > { %p2852_p13 = pneg %p2851_p12 }
  0x5f   : > { %p2857_p2 = pnand %p2855_p0, %p2852_p13 }
  0x61   : > { %2860 = shalt.err (!%p2857_p2)
}
  0x62   : > { %s2861_s22 = scalar_lea.vmem %s3208_s25, 1024  ;;  %p2869_p4 = scmp.lt.s32.totalorder %s3208_s25, %s3208_s25 }
  0x63   : > { %p2862_p5 = scmp.ne.s32.totalorder %s3208_s25, %s2861_s22  ;;  %p2870_p10 = scmp.lt.s32.totalorder %s2861_s22, %s2861_s22 }
  0x65   : > { %p2864_p7 = pnand %p2862_p5, %p3218_p8  ;;  %p2871_p11 = por %p2870_p10, %p2869_p4 }
  0x67   : > { %p2865_p9 = pneg %p2864_p7 }
  0x69   : > { %p2872_p12 = pnand %p2871_p11, %p2865_p9 }
  0x6b   : > { %2875 = shalt.err (!%p2872_p12)
}
  0x6c   : > { %2602 = dma.hbm_to_vmem [thread:$0]  (!%p3202_p6), %s3942_s10, 1024, %s3208_s25, [#allocation12], %s3922_s26, %s3922_s26, %s3923_s13  }
  0x6d   : > { %s3081_s8 = smov [#allocation10]   ;;  %s3082_s11 = smov [#allocation13]  }
  0x6e   : > { %s417_s9 = sshll.u32 %s3081_s8, 4  ;;  %s452_s27 = sshll.u32 %s3082_s11, 4  ;;  %s418_s9 = int_to_ptr.vmem [resolvable:$true] %s417_s9  ;;  %s453_s27 = int_to_ptr.vmem [resolvable:$true] %s452_s27 }
  0x6f   : > { %s3943_s7 = sld [smem:[#allocation25_spill]] }
  0x75   : > { %s2876_s24 = scalar_lea.hbm %s3943_s7, 1024 }
  0x76   : > { %p2877_p13 = scmp.ne.s32.totalorder %s3943_s7, %s2876_s24  ;;  %p2883_p5 = scmp.lt.u32.totalorder %s2876_s24, %s3943_s7 }
  0x78   : > { %p2879_p0 = pnand %p2877_p13, %p3218_p8 }
  0x7a   : > { %p2880_p2 = pneg %p2879_p0 }
  0x7c   : > { %p2885_p7 = pnand %p2883_p5, %p2880_p2 }
  0x7e   : > { %2888 = shalt.err (!%p2885_p7)
}
  0x7f   : > { %s2889_s25 = scalar_lea.vmem %s418_s9, 1024  ;;  %p2897_p11 = scmp.lt.s32.totalorder %s418_s9, %s418_s9 }
  0x80   : > { %p2890_p9 = scmp.ne.s32.totalorder %s418_s9, %s2889_s25  ;;  %p2898_p12 = scmp.lt.s32.totalorder %s2889_s25, %s2889_s25 }
  0x82   : > { %p2892_p4 = pnand %p2890_p9, %p3218_p8  ;;  %p2899_p1 = por %p2898_p12, %p2897_p11 }
  0x84   : > { %p2893_p10 = pneg %p2892_p4 }
  0x86   : > { %p2900_p3 = pnand %p2899_p1, %p2893_p10 }
  0x88   : > { %2903 = shalt.err (!%p2900_p3)
}
  0x89   : > { %2599 = dma.hbm_to_vmem [thread:$0]  (!%p3202_p6), %s3943_s7, 1024, %s418_s9, [#allocation9], %s3922_s26, %s3922_s26, %s3923_s13  }
  0x8a   : > { %s3944_s12 = sld [smem:[#allocation30_spill]] }
  0x90   : > { %s2904_s28 = scalar_lea.hbm %s3944_s12, 1024 }
  0x91   : > { %p2905_p1 = scmp.ne.s32.totalorder %s3944_s12, %s2904_s28  ;;  %p2911_p0 = scmp.lt.u32.totalorder %s2904_s28, %s3944_s12 }
  0x93   : > { %p2907_p3 = pnand %p2905_p1, %p3218_p8 }
  0x95   : > { %p2908_p13 = pneg %p2907_p3 }
  0x97   : > { %p2913_p2 = pnand %p2911_p0, %p2908_p13 }
  0x99   : > { %2916 = shalt.err (!%p2913_p2)
}
  0x9a   : > { %s2917_s18 = scalar_lea.vmem %s453_s27, 1024  ;;  %p2925_p4 = scmp.lt.s32.totalorder %s453_s27, %s453_s27 }
  0x9b   : > { %p2918_p5 = scmp.ne.s32.totalorder %s453_s27, %s2917_s18  ;;  %p2926_p10 = scmp.lt.s32.totalorder %s2917_s18, %s2917_s18 }
  0x9d   : > { %p2920_p7 = pnand %p2918_p5, %p3218_p8  ;;  %p2927_p11 = por %p2926_p10, %p2925_p4 }
  0x9f   : > { %p2921_p9 = pneg %p2920_p7 }
  0xa1   : > { %p2928_p12 = pnand %p2927_p11, %p2921_p9 }
  0xa3   : > { %2931 = shalt.err (!%p2928_p12)
}
  0xa4   : > { %2605 = dma.hbm_to_vmem [thread:$0]  (!%p3202_p6), %s3944_s12, 1024, %s453_s27, [#allocation12], %s3922_s26, %s3922_s26, %s3923_s13  }
  0xa5   : > { %s2246_s23 = sadd.s32 4294967294, %s3074_s16   ;;  %s3338_s21 = sadd.s32 1, %s3074_s16  }
  0xa6   : > { %s42_s2 = sadd.s32 1, %s3070_s15  ;;  %s39_s6 = ssub.s32 %s3074_s16, %s3338_s21 }
  0xa7   : > { %p49_p8 = scmp.ne.s32.totalorder %s3070_s15, %s3066_s30  ;;  %p40_p1 = scmp.eq.s32.totalorder %s39_s6, 0 }
  0xa8   : > { %p50_p3 = scmp.eq.s32.totalorder %s3074_s16, 0  ;;  %p55_p13 = scmp.ne.s32.totalorder %s3066_s30, %s3062_s29 }
  0xa9   : > { %p357_p0 = scmp.eq.s32.totalorder %s3186_s19, 1  ;;  %p3945_p5 = scmp.eq.s32.totalorder %s3186_s19, 0 }
  0xaa   : > { %s3350_s8 = scalar_select %p40_p1, %s3070_s15, %s42_s2  }
  0xab   : > { %p51_p2 = por %p50_p3, %p49_p8  ;;  %p3354_p7 = por %p3945_p5, %p55_p13 }
  0xac   : > { %p3358_p6 = por %p357_p0, %p49_p8  ;;  %p363_p9 = scmp.eq.s32.totalorder %s2246_s23, 1 }
  0xad   : > { %p2622_p4 = scmp.lt.s32.totalorder %s3074_s16, 2  ;;  %s3364_s28 = sand.u32 1, %s3070_s15  }
  0xae   : > { %s3947_s27 = scalar_select %p3358_p6, 1, 0 }
  0xaf   : > { %p3366_p10 = por %p363_p9, %p55_p13  ;;  %s2254_s24 = sshll.u32 %s3364_s28, 6 }
  0xb0   : > { %s2333_s14 = sshll.u32 %s3074_s16, 10  ;;  %s3949_s0 = sld [smem:[#allocation21_spill]] }
  0xb1   : > { %s3948_s17 = scalar_select %p3366_p10, 1, 0 }
  0xb2   : > { %s473_s25 = scalar_lea.vmem [#allocation2], %s2254_s24  ;;  %p3377_p11 = pnand %p2622_p4, %p51_p2 }
  0xb3   : > { %s480_s23 = sshll.u32 %s473_s25, 4  ;;  %s470_s6 = scalar_lea.sflag [#allocation3], %s3364_s28  ;;  %s3381_s23 = int_to_ptr.vmem [resolvable:$true] %s480_s23 }
  0xb4   : > { %p2934_p8 = pneg %p3377_p11 }
  0xb6   : > { %s3375_s9 = scalar_lea.hbm %s3949_s0, %s2333_s14  ;;  %s2937_s22 = scalar_lea.hbm %s3949_s0, 2048 }
  0xb7   : > { %s2932_s26 = scalar_lea.hbm %s3375_s9, 1024  ;;  %p2938_p13 = scmp.lt.u32.totalorder %s3375_s9, %s3949_s0 }
  0xb8   : > { %p2933_p12 = scmp.ne.s32.totalorder %s3375_s9, %s2932_s26  ;;  %p2939_p0 = scmp.lt.u32.totalorder %s2937_s22, %s2932_s26 }
  0xb9   : > { %p2941_p5 = scmp.lt.u32.totalorder %s2932_s26, %s3375_s9 }
  0xba   : > { %p2935_p1 = pnand %p2934_p8, %p2933_p12  ;;  %p2940_p2 = por %p2939_p0, %p2938_p13 }
  0xbc   : > { %p2936_p3 = pneg %p2935_p1  ;;  %p2942_p9 = por %p2941_p5, %p2940_p2 }
  0xbe   : > { %p2943_p4 = pnand %p2942_p9, %p2936_p3 }
  0xc0   : > { %2946 = shalt.err (!%p2943_p4)
}
  0xc1   : > { %s2947_s13 = scalar_lea.vmem %s3381_s23, 1024  ;;  %s3083_s14 = smov [#allocation2]  }
  0xc2   : > { %p2948_p12 = scmp.ne.s32.totalorder %s3381_s23, %s2947_s13  ;;  %s2952_s24 = sshll.u32 %s3083_s14, 4  ;;  %s2953_s24 = int_to_ptr.vmem [resolvable:$false] %s2952_s24 }
  0xc3   : > { %s2954_s18 = scalar_lea.vmem %s2953_s24, 2048  ;;  %p2955_p6 = scmp.lt.s32.totalorder %s3381_s23, %s2953_s24 }
  0xc4   : > { %p2950_p1 = pnand %p2948_p12, %p2934_p8  ;;  %p2956_p13 = scmp.lt.s32.totalorder %s2954_s18, %s2947_s13 }
  0xc6   : > { %p2951_p10 = pneg %p2950_p1  ;;  %p2957_p0 = por %p2956_p13, %p2955_p6 }
  0xc8   : > { %p2958_p2 = pnand %p2957_p0, %p2951_p10 }
  0xca   : > { %2961 = shalt.err (!%p2958_p2)
}
  0xcb   : > { %s3084_s26 = smov 128   ;;  %s3085_s22 = smov 8  }
  0xcc   : > { %2609 = dma.hbm_to_vmem [thread:$0]  (!%p3377_p11), %s3375_s9, 1024, %s3381_s23, %s470_s6, %s3084_s26, %s3084_s26, %s3085_s22  }
  0xcd   : > { %s490_s25 = sand.u32 1, %s3074_s16   ;;  %s2257_s14 = sshll.u32 %s3364_s28, 5 }
  0xce   : > { %s2334_s24 = sshll.u32 %s3074_s16, 9  ;;  %s494_s13 = scalar_lea.vmem [#allocation5], %s2257_s14 }
  0xcf   : > { %s501_s18 = sshll.u32 %s494_s13, 4  ;;  %s3417_s7 = scalar_lea.hbm %s3905_s1, %s2334_s24  ;;  %s3419_s18 = int_to_ptr.vmem [resolvable:$true] %s501_s18 }
  0xd0   : > { %s3421_s10 = scalar_lea.sflag [#allocation6], %s490_s25  ;;  %s2962_s12 = scalar_lea.hbm %s3417_s7, 512 }
  0xd1   : > { %p2963_p6 = scmp.ne.s32.totalorder %s3417_s7, %s2962_s12  ;;  %s2967_s0 = scalar_lea.hbm %s3905_s1, 1024 }
  0xd2   : > { %p2968_p5 = scmp.lt.u32.totalorder %s3417_s7, %s3905_s1  ;;  %p2969_p9 = scmp.lt.u32.totalorder %s2967_s0, %s2962_s12 }
  0xd3   : > { %p2965_p10 = pnand %p2963_p6, %p2934_p8  ;;  %p2971_p12 = scmp.lt.u32.totalorder %s2962_s12, %s3417_s7 }
  0xd4   : > { %p2970_p4 = por %p2969_p9, %p2968_p5 }
  0xd5   : > { %p2966_p3 = pneg %p2965_p10 }
  0xd6   : > { %p2972_p1 = por %p2971_p12, %p2970_p4 }
  0xd8   : > { %p2973_p13 = pnand %p2972_p1, %p2966_p3 }
  0xda   : > { %2976 = shalt.err (!%p2973_p13)
}
  0xdb   : > { %s2977_s6 = scalar_lea.vmem %s3419_s18, 512  ;;  %s3086_s26 = smov [#allocation5]  }
  0xdc   : > { %p2978_p0 = scmp.ne.s32.totalorder %s3419_s18, %s2977_s6  ;;  %s2982_s22 = sshll.u32 %s3086_s26, 4  ;;  %s2983_s22 = int_to_ptr.vmem [resolvable:$false] %s2982_s22 }
  0xdd   : > { %s2984_s25 = scalar_lea.vmem %s2983_s22, 1024  ;;  %p2985_p10 = scmp.lt.s32.totalorder %s3419_s18, %s2983_s22 }
  0xde   : > { %p2980_p2 = pnand %p2978_p0, %p2934_p8  ;;  %p2986_p5 = scmp.lt.s32.totalorder %s2984_s25, %s2977_s6 }
  0xe0   : > { %p2981_p6 = pneg %p2980_p2  ;;  %p2987_p9 = por %p2986_p5, %p2985_p10 }
  0xe2   : > { %p2988_p4 = pnand %p2987_p9, %p2981_p6 }
  0xe4   : > { %2991 = shalt.err (!%p2988_p4)
}
  0xe5   : > { %s3951_s12 = smov 4   ;;  %s3952_s14 = smov 64  }
  0xe6   : > { %2612 = dma.hbm_to_vmem [thread:$0]  (!%p3377_p11), %s3417_s7, 512, %s3419_s18, %s3421_s10, %s3952_s14, %s3952_s14, %s3951_s12  }
  0xe7   : > { %p3953_p8 = scmp.ne.s32.totalorder %s3937_s20, 0 }
  0xe8   : > { %s3453_s24 = sand.u32 (!%p3953_p8), 1, %s3066_s30  }
  0xe9   : > { %513 = sbr.rel (%p3953_p8) target bundleno = 2370 (0x942), region = 76  ;;  %s2261_s13 = sshll.u32 (!%p3953_p8), %s3453_s24, 6 }
  0xea   : > { %s516_s28 = scalar_lea.sflag (!%p3953_p8), [#allocation3], %s3453_s24  ;;  %s3459_s2 = scalar_lea.vmem (!%p3953_p8), [#allocation2], %s2261_s13 }
  0xf0   : > { %3037 = dma.done.wait (%p3354_p7), %s516_s28, 1024  }
  0xf1   : > { %3039 = vsyncadd (%p3354_p7), %s516_s28, 4294966272  ;;  %s524_s7 = sand.u32 1, %s3186_s19   ;;  %s2262_s10 = sshll.u32 %s3453_s24, 5 }
  0xf2   : > { %s525_s20 = scalar_lea.sflag [#allocation6], %s524_s7  ;;  %s3467_s18 = scalar_lea.vmem [#allocation5], %s2262_s10 }
  0xf3   : > { %3041 = dma.done.wait (%p3354_p7), %s525_s20, 512  }
  0xf4   : > { %3043 = vsyncadd (%p3354_p7), %s525_s20, 4294966784  ;;  %p3954_p11 = scmp.eq.s32.totalorder %s3186_s19, 0 }
  0xf6   : > { %3045 = dma.done.wait (%p3954_p11), [#allocation6], 1024   ;;  %p3955_p3 = pmov %p3954_p11 }
  0xf8   : > { %3047 = vsyncadd (%p3955_p3), [#allocation6], 4294966272  ;;  %p3956_p12 = pmov %p3955_p3 }
  0xf9   : > { %p3957_p1 = pmov %p3955_p3 }
  0xfa   : > { %3049 = dma.done.wait (%p3956_p12), [#allocation9], 2048  }
  0xfb   : > { %3051 = vsyncadd (%p3957_p1), [#allocation9], 4294965248  ;;  %p3958_p13 = pmov %p3957_p1 }
  0xfc   : > { %p3959_p0 = pmov %p3957_p1 }
  0xfd   : > { %3053 = dma.done.wait (%p3958_p13), [#allocation12], 2048  }
  0xfe   : > { %3055 = vsyncadd (%p3959_p0), [#allocation12], 4294965248  ;;  %v3486_v0 = vld [vmem:[%s3459_s2] sm:$0xff]  ;;  %v3489_v1 = vld [vmem:[%s3459_s2 + $0x8] sm:$0xff]  ;;  %vm706_vm0 = vcmask 523264   ;;  %s3960_s26 = sld [smem:[#allocation24_spill]] }
  0xff   : > { %v3492_v2 = vld [vmem:[%s3459_s2 + $0x10] sm:$0xff]  ;;  %v650_v3 = vmax.f32 %v3486_v0, 0.0  ;;  %v651_v4 = vmax.f32 %v3489_v1, 0.0  ;;  %v3497_v5 = vld [vmem:[%s3459_s2 + $0x18] sm:$0xff]  ;;  %v3501_v7 = vld [vmem:[%s3459_s2 + $0x20] sm:$0xff]  ;;  %v840_v16 = vmul.f32 %v3486_v0, %v3486_v0  ;;  %v841_v24 = vmul.f32 %v3489_v1, %v3489_v1  ;;  %s3961_s12 = sld [smem:[#allocation26_spill]] }
 0x100   : > { %v652_v6 = vmax.f32 %v3492_v2, 0.0  ;;  %v3504_v8 = vld [vmem:[%s3459_s2 + $0x28] sm:$0xff]  ;;  %v842_v9 = vmul.f32 %v3492_v2, %v3492_v2  ;;  %v653_v10 = vmax.f32 %v3497_v5, 0.0  ;;  %v654_v11 = vmax.f32 %v3501_v7, 0.0  ;;  %v3512_v13 = vld [vmem:[%s3459_s2 + $0x30] sm:$0xff]  ;;  %v3515_v14 = vld [vmem:[%s3459_s2 + $0x38] sm:$0xff] }
 0x101   : > { %v655_v12 = vmax.f32 %v3504_v8, 0.0  ;;  %v3518_v15 = vld [vmem:[%s3467_s18] sm:$0xff]   ;;  %v658_v17 = vadd.f32 1e-05, %v650_v3  ;;  %v659_v18 = vadd.f32 1e-05, %v651_v4  ;;  %v843_v20 = vmul.f32 %v3497_v5, %v3497_v5  ;;  %848 = vadd.xlane.f32.xlu0 %v840_v16 }
 0x102   : > { %v660_v19 = vadd.f32 1e-05, %v652_v6  ;;  %852 = vadd.xlane.f32.xlu1 %v842_v9  ;;  %v661_v21 = vadd.f32 1e-05, %v653_v10  ;;  %v662_v22 = vadd.f32 1e-05, %v654_v11  ;;  %2420 = vmatprep.mubr.msk.bf16.mxu1 %vm706_vm0, %v3518_v15  ;;  %v845_v43 = vmul.f32 %v3504_v8, %v3504_v8 }
 0x103   : > { %v663_v23 = vadd.f32 1e-05, %v655_v12  ;;  %v666_v25 = vmax.f32 %v658_v17, 0.0  ;;  %v667_v26 = vmax.f32 %v659_v18, 0.0  ;;  %v656_v28 = vmax.f32 %v3512_v13, 0.0  ;;  %v3535_v51 = vld [vmem:[%s3467_s18 + $0x8] sm:$0xff]  }
 0x104   : > { %v668_v27 = vmax.f32 %v660_v19, 0.0  ;;  %v669_v29 = vmax.f32 %v661_v21, 0.0  ;;  %v670_v30 = vmax.f32 %v662_v22, 0.0  ;;  %v657_v32 = vmax.f32 %v3515_v14, 0.0  ;;  %v3538_v52 = vld [vmem:[%s3467_s18 + $0x10] sm:$0xff]   ;;  %v3545_v53 = vld [vmem:[%s3467_s18 + $0x18] sm:$0xff]  }
 0x105   : > { %v671_v31 = vmax.f32 %v663_v23, 0.0  ;;  %v674_v33 = vmin.f32 %v666_v25, 100.0  ;;  %v675_v34 = vmin.f32 %v667_v26, 100.0  ;;  %v664_v36 = vadd.f32 1e-05, %v656_v28  ;;  %850 = vadd.xlane.f32.xlu0 %v841_v24  ;;  %v2676_v54 = vld [vmem:[#allocation7] sm:$0xff]  }
 0x106   : > { %v676_v35 = vmin.f32 %v668_v27, 100.0  ;;  %854 = vadd.xlane.f32.xlu1 %v843_v20  ;;  %v677_v37 = vmin.f32 %v669_v29, 100.0  ;;  %v678_v38 = vmin.f32 %v670_v30, 100.0  ;;  %v665_v40 = vadd.f32 1e-05, %v657_v32  ;;  %v2677_v32 = vld [vmem:[#allocation7 + $0x8] sm:$0xff]  }
 0x107   : > { %v679_v39 = vmin.f32 %v671_v31, 100.0  ;;  %v682_v41 = vpack.c.bf16 %v675_v34, %v674_v33  ;;  %v672_v42 = vmax.f32 %v664_v36, 0.0  ;;  %v844_v44 = vmul.f32 %v3501_v7, %v3501_v7  ;;  %v2679_v36 = vld [vmem:[#allocation7 + $0x18] sm:$0xff]   ;;  %s3962_s7 = sld [smem:[#allocation27_spill]]  ;;  %s3963_s18 = sld [smem:[#allocation29_spill]] }
 0x108   : > { %v683_v45 = vpack.c.bf16 %v677_v37, %v676_v35  ;;  %v673_v46 = vmax.f32 %v665_v40, 0.0  ;;  %v846_v21 = vmul.f32 %v3512_v13, %v3512_v13  ;;  %v847_v25 = vmul.f32 %v3515_v14, %v3515_v14  ;;  %v2678_v35 = vld [vmem:[#allocation7 + $0x10] sm:$0xff]   ;;  %v2680_v37 = vld [vmem:[#allocation7 + $0x20] sm:$0xff]   ;;  %v2683_v40 = vld [vmem:[#allocation7 + $0x38] sm:$0xff]   ;;  %s3964_s0 = sld [smem:[#allocation31_spill]]  ;;  %p3966_p2 = scmp.ne.s32.totalorder %s3947_s27, 0 }
 0x109   : > { %2412 = vmatprep.subr.bf16.mxu1 %v682_v41  ;;  %v680_v47 = vmin.f32 %v672_v42, 100.0  ;;  %856 = vadd.xlane.f32.xlu0 %v844_v44  ;;  %v684_v49 = vpack.c.bf16 %v679_v39, %v678_v38  ;;  %v2681_v38 = vld [vmem:[#allocation7 + $0x28] sm:$0xff]   ;;  %v2682_v39 = vld [vmem:[#allocation7 + $0x30] sm:$0xff]  }
 0x10a   : > { %858 = vadd.xlane.f32.xlu1 %v845_v43  ;;  %2413 = vmatpush3.bf16.msra.mxu1 %v682_v41  ;;  %v681_v48 = vmin.f32 %v673_v46, 100.0 }
 0x10b   : > { %2414 = vmatprep.subr.bf16.mxu1 %v683_v45 }
 0x10c   : > { %v685_v50 = vpack.c.bf16 %v681_v48, %v680_v47 }
 0x10e   : > { %2415 = vmatpush3.bf16.msra.mxu1 %v683_v45 }
 0x10f   : > { %2416 = vmatprep.subr.bf16.mxu1 %v684_v49 }
 0x112   : > { %2417 = vmatpush3.bf16.msra.mxu1 %v684_v49 }
 0x113   : > { %2418 = vmatprep.subr.bf16.mxu1 %v685_v50 }
 0x116   : > { %2419 = vmatpush3.bf16.msra.mxu1 %v685_v50 }
 0x117   : > { %2428 = vmatprep.subr.bf16.mxu1 %v2676_v54 }
 0x119   : > { %2421 = vmatmul.mubr.msk.bf16.vlgmr.msra.gmra.mrb[0].mxu1 %vm706_vm0, %v3535_v51 }
 0x11a   : > { %2424 = vmatprep.mubr.msk.bf16.mxu1 %vm706_vm0, %v3538_v52  ;;  %2429 = vmatpush3.bf16.msra.mxu1 %v2676_v54 }
 0x11b   : > { %2430 = vmatprep.subr.bf16.mxu1 %v2677_v32 }
 0x11e   : > { %2431 = vmatpush3.bf16.msra.mxu1 %v2677_v32 }
 0x11f   : > { %2432 = vmatprep.subr.bf16.mxu1 %v2678_v35 }
 0x121   : > { %2425 = vmatmul.mubr.msk.bf16.gmra.mrb[4].mxu1 %vm706_vm0, %v3545_v53 }
 0x122   : > { %2433 = vmatpush3.bf16.msra.mxu1 %v2678_v35 }
 0x123   : > { %2434 = vmatprep.subr.bf16.mxu1 %v2679_v36 }
 0x126   : > { %2435 = vmatpush3.bf16.msra.mxu1 %v2679_v36 }
 0x127   : > { %2436 = vmatprep.subr.bf16.mxu1 %v2680_v37 }
 0x12a   : > { %2437 = vmatpush3.bf16.msra.mxu1 %v2680_v37 }
 0x12b   : > { %2438 = vmatprep.subr.bf16.mxu1 %v2681_v38 }
 0x12e   : > { %2439 = vmatpush3.bf16.msra.mxu1 %v2681_v38 }
 0x12f   : > { %2440 = vmatprep.subr.bf16.mxu1 %v2682_v39 }
 0x132   : > { %2441 = vmatpush3.bf16.msra.mxu1 %v2682_v39 }
 0x133   : > { %2442 = vmatprep.subr.bf16.mxu1 %v2683_v40 }
 0x136   : > { %2443 = vmatpush3.bf16.msra.mxu1 %v2683_v40 }
 0x18e   : > { %v3585_v41 = vpop.xlane.xlu0 %848 }
 0x18f   : > { %v3587_v42 = vpop.xlane.xlu1 %852  ;;  %vm866_vm4 = vcmp.eq.f32.partialorder %v3585_v41, inf  ;;  %vm868_vm7 = vcmp.eq.f32.partialorder %v3585_v41, 0.0 }
 0x190   : > { %vm880_vm2 = vcmp.eq.f32.partialorder %v3587_v42, inf  ;;  %vm882_vm3 = vcmp.eq.f32.partialorder %v3587_v42, 0.0 }
 0x192   : > { %v3589_v43 = vpop.xlane.xlu0 %850 }
 0x193   : > { %v855_v44 = vpop.xlane.xlu1 %854  ;;  %vm873_vm6 = vcmp.eq.f32.partialorder %v3589_v43, inf  ;;  %vm875_vm8 = vcmp.eq.f32.partialorder %v3589_v43, 0.0 }
 0x194   : > { %2716 = vrsqrt.f32 %v855_v44  ;;  %vm887_vm1 = vcmp.eq.f32.partialorder %v855_v44, inf  ;;  %vm889_vm5 = vcmp.eq.f32.partialorder %v855_v44, 0.0 }
 0x195   : > { %2718 = vrsqrt.f32 %v3587_v42 }
 0x196   : > { %v3592_v45 = vpop.xlane.xlu0 %856  ;;  %2720 = vrsqrt.f32 %v3585_v41 }
 0x197   : > { %v3595_v46 = vpop.xlane.xlu1 %858  ;;  %2722 = vrsqrt.f32 %v3589_v43  ;;  %vm894_vm9 = vcmp.eq.f32.partialorder %v3592_v45, inf  ;;  %vm896_vm11 = vcmp.eq.f32.partialorder %v3592_v45, 0.0 }
 0x198   : > { %2724 = vrsqrt.f32 %v3592_v45  ;;  %vm901_vm10 = vcmp.eq.f32.partialorder %v3595_v46, inf  ;;  %vm903_vm12 = vcmp.eq.f32.partialorder %v3595_v46, 0.0 }
 0x1ec   : > { %v2422_v55 = vpop.f32.mrb[0].mxu1 }
 0x1ed   : > { %v786_v56 = vmax.f32 %v2422_v55, 0.0  ;;  %v753_v57 = vpop.f32.mrb[1].mxu1  ;;  %v2717_v55 = vpop.eup %2716 }
 0x1ee   : > { %v784_v58 = vmax.f32 %v753_v57, 0.0  ;;  %v2423_v59 = vpop.f32.mrb[2].mxu1  ;;  %v2719_v57 = vpop.eup %2718 }
 0x1ef   : > { %v3549_v60 = vmin.f32 %v786_v56, 100.0  ;;  %v787_v61 = vmax.f32 %v2423_v59, 0.0  ;;  %v756_v62 = vpop.f32.mrb[3].mxu1  ;;  %v2721_v59 = vpop.eup %2720 }
 0x1f0   : > { %v785_v63 = vmax.f32 %v756_v62, 0.0  ;;  %v3551_v3 = vmin.f32 %v784_v58, 100.0  ;;  %v886_v62 = vmul.f32 %v2717_v55, %v855_v44 }
 0x1f1   : > { %v3553_v4 = vmin.f32 %v787_v61, 100.0  ;;  %v802_v6 = vmul.f32 %v3549_v60, %v3549_v60 }
 0x1f2   : > { %v3557_v9 = vmin.f32 %v785_v63, 100.0  ;;  %v800_v16 = vmul.f32 %v3551_v3, %v3551_v3 }
 0x1f3   : > { %812 = vadd.xlane.f32.xlu0 %v802_v6  ;;  %v803_v10 = vmul.f32 %v3553_v4, %v3553_v4  ;;  %v2723_v6 = vpop.eup %2722 }
 0x1f4   : > { %v2426_v11 = vpop.f32.mrb[4].mxu1  ;;  %v801_v20 = vmul.f32 %v3557_v9, %v3557_v9 }
 0x1f5   : > { %814 = vadd.xlane.f32.xlu1 %v803_v10  ;;  %v769_v12 = vpop.f32.mrb[5].mxu1  ;;  %v790_v24 = vmax.f32 %v2426_v11, 0.0  ;;  %v879_v10 = vmul.f32 %v2719_v57, %v3587_v42  ;;  %v865_v11 = vmul.f32 %v2721_v59, %v3585_v41 }
 0x1f6   : > { %v788_v17 = vmax.f32 %v769_v12, 0.0  ;;  %v2427_v18 = vpop.f32.mrb[6].mxu1 }
 0x1f7   : > { %808 = vadd.xlane.f32.xlu0 %v800_v16  ;;  %v772_v19 = vpop.f32.mrb[7].mxu1  ;;  %v791_v26 = vmax.f32 %v2427_v18, 0.0  ;;  %v3575_v29 = vmin.f32 %v790_v24, 100.0  ;;  %v890_v16 = vand.u32 2147483648, %v855_v44  ;;  %v888_v18 = vsel %vm887_vm1, %v855_v44, %v886_v62 }
 0x1f8   : > { %v3567_v22 = vmin.f32 %v788_v17, 100.0  ;;  %v789_v23 = vmax.f32 %v772_v19, 0.0  ;;  %v883_v17 = vand.u32 2147483648, %v3587_v42  ;;  %v872_v19 = vmul.f32 %v2723_v6, %v3589_v43 }
 0x1f9   : > { %810 = vadd.xlane.f32.xlu1 %v801_v20  ;;  %v3577_v30 = vmin.f32 %v791_v26, 100.0  ;;  %v806_v33 = vmul.f32 %v3575_v29, %v3575_v29  ;;  %v869_v24 = vand.u32 2147483648, %v3585_v41 }
 0x1fa   : > { %v3571_v27 = vmin.f32 %v789_v23, 100.0  ;;  %v804_v28 = vmul.f32 %v3567_v22, %v3567_v22  ;;  %v881_v23 = vsel %vm880_vm2, %v3587_v42, %v879_v10  ;;  %v874_v37 = vsel %vm873_vm6, %v3589_v43, %v872_v19 }
 0x1fb   : > { %860 = vadd.xlane.f32.xlu0 %v846_v21  ;;  %v807_v34 = vmul.f32 %v3577_v30, %v3577_v30  ;;  %v2725_v21 = vpop.eup %2724  ;;  %v884_v38 = vsel %vm882_vm3, %v883_v17, %v881_v23  ;;  %v897_v10 = vand.u32 2147483648, %v3592_v45 }
 0x1fc   : > { %v805_v31 = vmul.f32 %v3571_v27, %v3571_v27 }
 0x1fd   : > { %862 = vadd.xlane.f32.xlu1 %v847_v25 }
 0x1ff   : > { %816 = vadd.xlane.f32.xlu0 %v804_v28  ;;  %v867_v28 = vsel %vm866_vm4, %v3585_v41, %v865_v11 }
 0x201   : > { %818 = vadd.xlane.f32.xlu1 %v805_v31 }
 0x203   : > { %820 = vadd.xlane.f32.xlu0 %v806_v33  ;;  %v876_v33 = vand.u32 2147483648, %v3589_v43 }
 0x205   : > { %822 = vadd.xlane.f32.xlu1 %v807_v34  ;;  %v891_v34 = vsel %vm889_vm5, %v890_v16, %v888_v18 }
 0x280   : > { %v813_v47 = vpop.xlane.xlu0 %812 }
 0x281   : > { %v826_v48 = vmax.f32 %v813_v47, 1e-24 }
 0x282   : > { %v815_v49 = vpop.xlane.xlu1 %814 }
 0x283   : > { %v827_v50 = vmax.f32 %v815_v49, 1e-24  ;;  %2726 = vrsqrt.f32 %v826_v48  ;;  %v870_v49 = vsel %vm868_vm7, %v869_v24, %v867_v28 }
 0x284   : > { %v809_v54 = vpop.xlane.xlu0 %808 }
 0x285   : > { %2728 = vrsqrt.f32 %v827_v50  ;;  %v824_v56 = vmax.f32 %v809_v54, 1e-24  ;;  %v893_v50 = vmul.f32 %v2725_v21, %v3592_v45 }
 0x286   : > { %2730 = vrsqrt.f32 %v3595_v46  ;;  %v811_v58 = vpop.xlane.xlu1 %810 }
 0x287   : > { %2732 = vrsqrt.f32 %v824_v56  ;;  %v825_v61 = vmax.f32 %v811_v58, 1e-24  ;;  %v877_v58 = vsel %vm875_vm8, %v876_v33, %v874_v37 }
 0x288   : > { %v3600_v63 = vpop.xlane.xlu0 %860 }
 0x289   : > { %2734 = vrsqrt.f32 %v825_v61  ;;  %vm908_vm13 = vcmp.eq.f32.partialorder %v3600_v63, inf  ;;  %vm910_vm15 = vcmp.eq.f32.partialorder %v3600_v63, 0.0 }
 0x28a   : > { %2736 = vrsqrt.f32 %v3600_v63  ;;  %v3606_v12 = vpop.xlane.xlu1 %862 }
 0x28b   : > { %2738 = vrsqrt.f32 %v3606_v12  ;;  %vm915_vm14 = vcmp.eq.f32.partialorder %v3606_v12, inf  ;;  %v918_v33 = vand.u32 2147483648, %v3606_v12  ;;  %vm917_vm1 = vcmp.eq.f32.partialorder %v3606_v12, 0.0 }
 0x28c   : > { %v817_v20 = vpop.xlane.xlu0 %816 }
 0x28d   : > { %v828_v25 = vmax.f32 %v817_v20, 1e-24  ;;  %v2727_v26 = vpop.eup %2726 }
 0x28e   : > { %v819_v31 = vpop.xlane.xlu1 %818  ;;  %v922_v47 = vmul.f32 %v2727_v26, %v884_v38 }
 0x28f   : > { %v2729_v32 = vpop.eup %2728  ;;  %2740 = vrsqrt.f32 %v828_v25  ;;  %v829_v35 = vmax.f32 %v819_v31, 1e-24 }
 0x290   : > { %v2731_v36 = vpop.eup %2730  ;;  %v923_v39 = vmul.f32 %v2729_v32, %v891_v34  ;;  %v821_v40 = vpop.xlane.xlu0 %820  ;;  %v930_v11 = vmul.f32 %v922_v47, %v3549_v60 }
 0x291   : > { %v2733_v44 = vpop.eup %2732  ;;  %2742 = vrsqrt.f32 %v829_v35  ;;  %v830_v48 = vmax.f32 %v821_v40, 1e-24  ;;  %v900_v61 = vmul.f32 %v2731_v36, %v3595_v46 }
 0x292   : > { %v823_v54 = vpop.xlane.xlu1 %822  ;;  %v920_v55 = vmul.f32 %v2733_v44, %v870_v49  ;;  %v931_v57 = vmul.f32 %v923_v39, %v3553_v4  ;;  %v895_v4 = vsel %vm894_vm9, %v3592_v45, %v893_v50  ;;  %v938_v45 = vadd.f32 %v930_v11, %v3492_v2 }
 0x293   : > { %v2735_v56 = vpop.eup %2734  ;;  %2744 = vrsqrt.f32 %v830_v48  ;;  %v831_v42 = vmax.f32 %v823_v54, 1e-24  ;;  %v902_v18 = vsel %vm901_vm10, %v3595_v46, %v900_v61 }
 0x294   : > { %v2737_v59 = vpop.eup %2736  ;;  %v921_v62 = vmul.f32 %v2735_v56, %v877_v58  ;;  %v928_v41 = vmul.f32 %v920_v55, %v3551_v3  ;;  %v904_v3 = vand.u32 2147483648, %v3595_v46  ;;  %v939_v17 = vadd.f32 %v931_v57, %v3497_v5 }
 0x295   : > { %v2739_v6 = vpop.eup %2738  ;;  %2746 = vrsqrt.f32 %v831_v42  ;;  %v907_v43 = vmul.f32 %v2737_v59, %v3600_v63  ;;  %v911_v5 = vand.u32 2147483648, %v3600_v63 }
 0x296   : > { %v929_v16 = vmul.f32 %v921_v62, %v3557_v9  ;;  %v914_v60 = vmul.f32 %v2739_v6, %v3606_v12  ;;  %v936_v19 = vadd.f32 %v928_v41, %v3486_v0  ;;  %v898_v9 = vsel %vm896_vm11, %v897_v10, %v895_v4 }
 0x297   : > { %v909_v23 = vsel %vm908_vm13, %v3600_v63, %v907_v43  ;;  %v945_v28 = vpack.c.bf16 %v939_v17, %v938_v45  ;;  %v905_v0 = vsel %vm903_vm12, %v904_v3, %v902_v18 }
 0x298   : > { %v937_v20 = vadd.f32 %v929_v16, %v3489_v1  ;;  %v916_v1 = vsel %vm915_vm14, %v3606_v12, %v914_v60  ;;  %v912_v34 = vsel %vm910_vm15, %v911_v5, %v909_v23 }
 0x299   : > { %v2741_v21 = vpop.eup %2740  ;;  %v919_v37 = vsel %vm917_vm1, %v918_v33, %v916_v1 }
 0x29a   : > { %v944_v24 = vpack.c.bf16 %v937_v20, %v936_v19  ;;  %v924_v25 = vmul.f32 %v2741_v21, %v898_v9 }
 0x29b   : > { %v2743_v26 = vpop.eup %2742 }
 0x29c   : > { %2444 = vmatprep.mubr.bf16.mxu1 %v944_v24  ;;  %v925_v2 = vmul.f32 %v2743_v26, %v905_v0  ;;  %v932_v31 = vmul.f32 %v924_v25, %v3567_v22 }
 0x29d   : > { %v2745_v32 = vpop.eup %2744  ;;  %2445 = vmatmul.mubr.bf16.vlgmr.msra.gmra.mrb[8].mxu1 %v945_v28 }
 0x29e   : > { %v933_v35 = vmul.f32 %v925_v2, %v3571_v27  ;;  %v926_v36 = vmul.f32 %v2745_v32, %v912_v34  ;;  %v940_v63 = vadd.f32 %v932_v31, %v3501_v7  ;;  %v2684_v27 = vld [vmem:[#allocation8] sm:$0xff]   ;;  %v2685_v7 = vld [vmem:[#allocation8 + $0x8] sm:$0xff]  }
 0x29f   : > { %v2747_v46 = vpop.eup %2746  ;;  %2452 = vmatprep.subr.bf16.mxu0 %v2684_v27 }
 0x2a0   : > { %v941_v38 = vadd.f32 %v933_v35, %v3504_v8  ;;  %v927_v39 = vmul.f32 %v2747_v46, %v919_v37  ;;  %v934_v40 = vmul.f32 %v926_v36, %v3575_v29  ;;  %2453 = vmatpush3.bf16.msra.mxu0 %v2684_v27  ;;  %v2686_v8 = vld [vmem:[#allocation8 + $0x10] sm:$0xff]   ;;  %v2687_v29 = vld [vmem:[#allocation8 + $0x18] sm:$0xff]   ;;  %v2285_v27 = vld [vmem:[%s3907_s3] ss:$0 sm:$0xff] }
 0x2a1   : > { %2454 = vmatprep.subr.bf16.mxu0 %v2685_v7 }
 0x2a2   : > { %v946_v22 = vpack.c.bf16 %v941_v38, %v940_v63  ;;  %v935_v44 = vmul.f32 %v927_v39, %v3577_v30  ;;  %v942_v47 = vadd.f32 %v934_v40, %v3512_v13  ;;  %v2688_v13 = vld [vmem:[#allocation8 + $0x20] sm:$0xff]   ;;  %v2690_v30 = vld [vmem:[#allocation8 + $0x30] sm:$0xff]  }
 0x2a4   : > { %2448 = vmatprep.mubr.bf16.mxu1 %v946_v22  ;;  %v943_v12 = vadd.f32 %v935_v44, %v3515_v14  ;;  %2455 = vmatpush3.bf16.msra.mxu0 %v2685_v7  ;;  %v2689_v14 = vld [vmem:[#allocation8 + $0x28] sm:$0xff]  }
 0x2a5   : > { %2456 = vmatprep.subr.bf16.mxu0 %v2686_v8 }
 0x2a6   : > { %v947_v48 = vpack.c.bf16 %v943_v12, %v942_v47 }
 0x2a8   : > { %2449 = vmatmul.mubr.bf16.gmra.mrb[12].mxu1 %v947_v48  ;;  %2457 = vmatpush3.bf16.msra.mxu0 %v2686_v8 }
 0x2a9   : > { %2484 = vmatprep.mubr.msk.bf16.mxu1 %vm706_vm0, %v3518_v15  ;;  %2458 = vmatprep.subr.bf16.mxu0 %v2687_v29  ;;  %v2691_v15 = vld [vmem:[#allocation8 + $0x38] sm:$0xff]  }
 0x2ac   : > { %2459 = vmatpush3.bf16.msra.mxu0 %v2687_v29 }
 0x2ad   : > { %2460 = vmatprep.subr.bf16.mxu0 %v2688_v13 }
 0x2b0   : > { %2461 = vmatpush3.bf16.msra.mxu0 %v2688_v13 }
 0x2b1   : > { %2462 = vmatprep.subr.bf16.mxu0 %v2689_v14 }
 0x2b4   : > { %2463 = vmatpush3.bf16.msra.mxu0 %v2689_v14 }
 0x2b5   : > { %2464 = vmatprep.subr.bf16.mxu0 %v2690_v30 }
 0x2b8   : > { %2465 = vmatpush3.bf16.msra.mxu0 %v2690_v30  ;;  %v2286_v30 = vld [vmem:[%s3908_s4] ss:$0 sm:$0xff] }
 0x2b9   : > { %2466 = vmatprep.subr.bf16.mxu0 %v2691_v15 }
 0x2bc   : > { %2467 = vmatpush3.bf16.msra.mxu0 %v2691_v15 }
 0x370   : > { %v2446_v49 = vpop.f32.mrb[8].mxu1 }
 0x371   : > { %v1030_v50 = vpop.f32.mrb[9].mxu1 }
 0x372   : > { %v2447_v54 = vpop.f32.mrb[10].mxu1 }
 0x373   : > { %v1033_v55 = vpop.f32.mrb[11].mxu1 }
 0x374   : > { %v1061_v56 = vadd.f32 %v1033_v55, %v1030_v50 }
 0x376   : > { %v1062_v57 = vadd.f32 %v2446_v49, %v1061_v56 }
 0x378   : > { %v1063_v42 = vadd.f32 %v2447_v54, %v1062_v57 }
 0x37b   : > { %v2450_v58 = vpop.f32.mrb[12].mxu1 }
 0x37c   : > { %v1046_v59 = vpop.f32.mrb[13].mxu1 }
 0x37d   : > { %v1064_v61 = vadd.f32 %v1063_v42, %v1046_v59  ;;  %v2451_v62 = vpop.f32.mrb[14].mxu1 }
 0x37e   : > { %v1049_v41 = vpop.f32.mrb[15].mxu1 }
 0x37f   : > { %v1065_v6 = vadd.f32 %v1064_v61, %v1049_v41 }
 0x381   : > { %v1066_v10 = vadd.f32 %v2450_v58, %v1065_v6 }
 0x383   : > { %v1067_v11 = vadd.f32 %v2451_v62, %v1066_v10 }
 0x385   : > { %v1068_v4 = vrot.slane %v1067_v11, 4 }
 0x387   : > { %v1069_v43 = vadd.f32 %v1068_v4, %v1067_v11 }
 0x389   : > { %v1070_v16 = vrot.slane %v1069_v43, 2 }
 0x38b   : > { %v1071_v3 = vadd.f32 %v1070_v16, %v1069_v43 }
 0x38d   : > { %v1072_v17 = vrot.slane %v1071_v3, 1 }
 0x38f   : > { %v1073_v18 = vadd.f32 %v1072_v17, %v1071_v3 }
 0x391   : > { %v1075_v60 = vmul.f32 0.015625, %v1073_v18 }
 0x393   : > { %v1076_v19 = vsub.f32 %v1030_v50, %v1075_v60  ;;  %v1077_v20 = vsub.f32 %v1033_v55, %v1075_v60  ;;  %v1078_v21 = vsub.f32 %v2446_v49, %v1075_v60  ;;  %v1079_v45 = vsub.f32 %v2447_v54, %v1075_v60 }
 0x394   : > { %v1080_v9 = vsub.f32 %v1046_v59, %v1075_v60  ;;  %v1081_v23 = vsub.f32 %v1049_v41, %v1075_v60  ;;  %v1082_v24 = vsub.f32 %v2450_v58, %v1075_v60  ;;  %v1083_v25 = vsub.f32 %v2451_v62, %v1075_v60 }
 0x395   : > { %v1084_v26 = vmul.f32 %v1076_v19, %v1076_v19  ;;  %v1085_v5 = vmul.f32 %v1077_v20, %v1077_v20  ;;  %v1086_v28 = vmul.f32 %v1078_v21, %v1078_v21  ;;  %v1087_v1 = vmul.f32 %v1079_v45, %v1079_v45 }
 0x396   : > { %v1088_v31 = vmul.f32 %v1080_v9, %v1080_v9  ;;  %v1089_v33 = vmul.f32 %v1081_v23, %v1081_v23  ;;  %v1090_v35 = vmul.f32 %v1082_v24, %v1082_v24  ;;  %v1091_v46 = vmul.f32 %v1083_v25, %v1083_v25 }
 0x397   : > { %v1092_v0 = vadd.f32 %v1085_v5, %v1084_v26  ;;  %v1117_v7 = vmul.f32 %v2285_v27, %v1081_v23  ;;  %v1112_v8 = vmul.f32 %v2285_v27, %v1076_v19  ;;  %v1113_v29 = vmul.f32 %v2285_v27, %v1077_v20  ;;  %v2287_v5 = vld [vmem:[%s3960_s26] ss:$0 sm:$0xff]  ;;  %s3965_s26 = sld [smem:[#allocation32_spill]] }
 0x398   : > { %v1114_v13 = vmul.f32 %v2285_v27, %v1078_v21  ;;  %v1115_v15 = vmul.f32 %v2285_v27, %v1079_v45  ;;  %v1116_v49 = vmul.f32 %v2285_v27, %v1080_v9  ;;  %v1118_v50 = vmul.f32 %v2285_v27, %v1082_v24 }
 0x399   : > { %v1093_v2 = vadd.f32 %v1092_v0, %v1086_v28  ;;  %v1119_v54 = vmul.f32 %v2285_v27, %v1083_v25 }
 0x39b   : > { %v1094_v32 = vadd.f32 %v1093_v2, %v1087_v1 }
 0x39d   : > { %v1095_v34 = vadd.f32 %v1094_v32, %v1088_v31 }
 0x39f   : > { %v1096_v36 = vadd.f32 %v1095_v34, %v1089_v33 }
 0x3a1   : > { %v1097_v37 = vadd.f32 %v1096_v36, %v1090_v35 }
 0x3a3   : > { %v1098_v63 = vadd.f32 %v1097_v37, %v1091_v46 }
 0x3a5   : > { %v1099_v38 = vrot.slane %v1098_v63, 4 }
 0x3a7   : > { %v1100_v39 = vadd.f32 %v1099_v38, %v1098_v63 }
 0x3a9   : > { %v1101_v40 = vrot.slane %v1100_v39, 2 }
 0x3ab   : > { %v1102_v22 = vadd.f32 %v1101_v40, %v1100_v39 }
 0x3ad   : > { %v1103_v44 = vrot.slane %v1102_v22, 1 }
 0x3af   : > { %v1104_v47 = vadd.f32 %v1103_v44, %v1102_v22 }
 0x3b1   : > { %v1105_v12 = vmul.f32 0.015625, %v1104_v47 }
 0x3b3   : > { %v1120_v48 = vadd.f32 1e-05, %v1105_v12 }
 0x3b5   : > { %2748 = vrsqrt.f32 %v1120_v48 }
 0x3bf   : > { %v2749_v14 = vpop.eup %2748 }
 0x3c0   : > { %v1127_v55 = vmul.f32 %v2749_v14, %v1117_v7  ;;  %v1122_v56 = vmul.f32 %v2749_v14, %v1112_v8  ;;  %v1123_v57 = vmul.f32 %v2749_v14, %v1113_v29  ;;  %v1124_v42 = vmul.f32 %v2749_v14, %v1114_v13 }
 0x3c1   : > { %v1125_v58 = vmul.f32 %v2749_v14, %v1115_v15  ;;  %v1126_v59 = vmul.f32 %v2749_v14, %v1116_v49  ;;  %v1128_v61 = vmul.f32 %v2749_v14, %v1118_v50  ;;  %v1129_v62 = vmul.f32 %v2749_v14, %v1119_v54 }
 0x3c2   : > { %v1136_v41 = vadd.f32 %v2286_v30, %v1122_v56  ;;  %v1137_v6 = vadd.f32 %v2286_v30, %v1123_v57  ;;  %v1138_v10 = vadd.f32 %v2286_v30, %v1124_v42  ;;  %v1141_v11 = vadd.f32 %v2286_v30, %v1127_v55 }
 0x3c3   : > { %v1139_v4 = vadd.f32 %v2286_v30, %v1125_v58  ;;  %v1140_v43 = vadd.f32 %v2286_v30, %v1126_v59  ;;  %v1142_v16 = vadd.f32 %v2286_v30, %v1128_v61  ;;  %v1143_v3 = vadd.f32 %v2286_v30, %v1129_v62 }
 0x3c4   : > { %v1144_v17 = vmax.f32 %v1136_v41, 0.0  ;;  %v1145_v18 = vmax.f32 %v1137_v6, 0.0  ;;  %v1146_v60 = vmax.f32 %v1138_v10, 0.0  ;;  %v1149_v19 = vmax.f32 %v1141_v11, 0.0 }
 0x3c5   : > { %v1147_v20 = vmax.f32 %v1139_v4, 0.0  ;;  %v1148_v21 = vmax.f32 %v1140_v43, 0.0  ;;  %v1150_v45 = vmax.f32 %v1142_v16, 0.0  ;;  %v1151_v9 = vmax.f32 %v1143_v3, 0.0 }
 0x3c6   : > { %v1152_v23 = vpack.c.bf16 %v1145_v18, %v1144_v17 }
 0x3c7   : > { %v1153_v24 = vpack.c.bf16 %v1147_v20, %v1146_v60  ;;  %v1154_v25 = vpack.c.bf16 %v1149_v19, %v1148_v21  ;;  %v1155_v26 = vpack.c.bf16 %v1151_v9, %v1150_v45 }
 0x3c8   : > { %2468 = vmatprep.mubr.bf16.mxu0 %v1152_v23 }
 0x3c9   : > { %2469 = vmatmul.mubr.bf16.vlgmr.msra.gmra.mrb[0].mxu0 %v1153_v24 }
 0x3ca   : > { %2472 = vmatprep.mubr.bf16.mxu0 %v1154_v25 }
 0x3d1   : > { %2473 = vmatmul.mubr.bf16.gmra.mrb[4].mxu0 %v1155_v26 }
 0x49c   : > { %v2470_v28 = vpop.f32.mrb[0].mxu0 }
 0x49d   : > { %v1253_v0 = vadd.f32 %v2470_v28, %v2287_v5  ;;  %v1244_v1 = vpop.f32.mrb[1].mxu0 }
 0x49e   : > { %v1245_v2 = vadd.f32 %v2287_v5, %v1244_v1  ;;  %v2471_v31 = vpop.f32.mrb[2].mxu0 }
 0x49f   : > { %v1277_v32 = vmax.f32 %v1253_v0, 0.0  ;;  %v1256_v33 = vadd.f32 %v2471_v31, %v2287_v5  ;;  %v1247_v34 = vpop.f32.mrb[3].mxu0 }
 0x4a0   : > { %v1275_v35 = vmax.f32 %v1245_v2, 0.0  ;;  %v1248_v36 = vadd.f32 %v2287_v5, %v1247_v34 }
 0x4a1   : > { %v3678_v46 = vadd.f32 1e-05, %v1277_v32  ;;  %v1278_v37 = vmax.f32 %v1256_v33, 0.0 }
 0x4a2   : > { %v3680_v63 = vadd.f32 1e-05, %v1275_v35  ;;  %v1276_v38 = vmax.f32 %v1248_v36, 0.0 }
 0x4a3   : > { %v1328_v39 = vmax.f32 %v3678_v46, 0.0  ;;  %v3683_v40 = vadd.f32 1e-05, %v1278_v37  ;;  %v1485_v22 = vmul.f32 %v3678_v46, %v3678_v46 }
 0x4a4   : > { %v1326_v44 = vmax.f32 %v3680_v63, 0.0  ;;  %v3688_v47 = vadd.f32 1e-05, %v1276_v38  ;;  %v2474_v12 = vpop.f32.mrb[4].mxu0  ;;  %v1483_v49 = vmul.f32 %v3680_v63, %v3680_v63 }
 0x4a5   : > { %v1336_v48 = vadd.f32 1e-05, %v1328_v39  ;;  %v1329_v27 = vmax.f32 %v3683_v40, 0.0  ;;  %v1269_v7 = vadd.f32 %v2474_v12, %v2287_v5  ;;  %1495 = vadd.xlane.f32.xlu0 %v1485_v22  ;;  %v1260_v8 = vpop.f32.mrb[5].mxu0  ;;  %v1486_v29 = vmul.f32 %v3683_v40, %v3683_v40  ;;  %v2692_v22 = vld [vmem:[#allocation10] sm:$0xff]  }
 0x4a6   : > { %v1334_v13 = vadd.f32 1e-05, %v1326_v44  ;;  %v1327_v14 = vmax.f32 %v3688_v47, 0.0  ;;  %v1261_v30 = vadd.f32 %v2287_v5, %v1260_v8  ;;  %v2475_v15 = vpop.f32.mrb[6].mxu0  ;;  %v1484_v57 = vmul.f32 %v3688_v47, %v3688_v47  ;;  %2492 = vmatprep.subr.bf16.mxu0 %v2692_v22 }
 0x4a7   : > { %v1337_v50 = vadd.f32 1e-05, %v1329_v27  ;;  %v1281_v54 = vmax.f32 %v1269_v7, 0.0  ;;  %v1272_v55 = vadd.f32 %v2475_v15, %v2287_v5  ;;  %1497 = vadd.xlane.f32.xlu1 %v1486_v29  ;;  %v1263_v56 = vpop.f32.mrb[7].mxu0  ;;  %v1344_v6 = vmax.f32 %v1336_v48, 0.0  ;;  %2493 = vmatpush3.bf16.msra.mxu0 %v2692_v22 }
 0x4a8   : > { %v1335_v42 = vadd.f32 1e-05, %v1327_v14  ;;  %v1279_v58 = vmax.f32 %v1261_v30, 0.0  ;;  %v1264_v59 = vadd.f32 %v2287_v5, %v1263_v56  ;;  %v1342_v61 = vmax.f32 %v1334_v13, 0.0 }
 0x4a9   : > { %v3698_v62 = vadd.f32 1e-05, %v1281_v54  ;;  %v1282_v41 = vmax.f32 %v1272_v55, 0.0  ;;  %1491 = vadd.xlane.f32.xlu0 %v1483_v49  ;;  %v1345_v10 = vmax.f32 %v1337_v50, 0.0  ;;  %v1352_v23 = vmin.f32 %v1344_v6, 100.0 }
 0x4aa   : > { %v3700_v11 = vadd.f32 1e-05, %v1279_v58  ;;  %v1280_v4 = vmax.f32 %v1264_v59, 0.0  ;;  %v1343_v43 = vmax.f32 %v1335_v42, 0.0  ;;  %v1350_v17 = vmin.f32 %v1342_v61, 100.0 }
 0x4ab   : > { %v1332_v16 = vmax.f32 %v3698_v62, 0.0  ;;  %v3703_v3 = vadd.f32 1e-05, %v1282_v41  ;;  %1493 = vadd.xlane.f32.xlu1 %v1484_v57  ;;  %v1353_v18 = vmin.f32 %v1345_v10, 100.0  ;;  %v1489_v41 = vmul.f32 %v3698_v62, %v3698_v62 }
 0x4ac   : > { %v1330_v60 = vmax.f32 %v3700_v11, 0.0  ;;  %v3706_v19 = vadd.f32 1e-05, %v1280_v4  ;;  %v1487_v20 = vmul.f32 %v3700_v11, %v3700_v11  ;;  %v1351_v21 = vmin.f32 %v1343_v43, 100.0 }
 0x4ad   : > { %v1340_v45 = vadd.f32 1e-05, %v1332_v16  ;;  %v1333_v9 = vmax.f32 %v3703_v3, 0.0  ;;  %v1359_v1 = vpack.c.bf16 %v1353_v18, %v1352_v23  ;;  %v1490_v4 = vmul.f32 %v3703_v3, %v3703_v3  ;;  %v2696_v23 = vld [vmem:[#allocation10 + $0x20] sm:$0xff]  }
 0x4ae   : > { %v1338_v24 = vadd.f32 1e-05, %v1330_v60  ;;  %v1331_v25 = vmax.f32 %v3706_v19, 0.0  ;;  %1499 = vadd.xlane.f32.xlu0 %v1487_v20  ;;  %v1488_v26 = vmul.f32 %v3706_v19, %v3706_v19  ;;  %v1358_v5 = vpack.c.bf16 %v1351_v21, %v1350_v17  ;;  %v2693_v21 = vld [vmem:[#allocation10 + $0x8] sm:$0xff]  }
 0x4af   : > { %v1341_v28 = vadd.f32 1e-05, %v1333_v9  ;;  %v1348_v33 = vmax.f32 %v1340_v45, 0.0  ;;  %2494 = vmatprep.subr.bf16.mxu0 %v2693_v21  ;;  %v2694_v45 = vld [vmem:[#allocation10 + $0x10] sm:$0xff]   ;;  %v2695_v9 = vld [vmem:[#allocation10 + $0x18] sm:$0xff]  }
 0x4b0   : > { %v1339_v0 = vadd.f32 1e-05, %v1331_v25  ;;  %1501 = vadd.xlane.f32.xlu1 %v1488_v26  ;;  %2476 = vmatprep.subr.bf16.mxu1 %v1358_v5  ;;  %v1346_v2 = vmax.f32 %v1338_v24, 0.0  ;;  %v2697_v24 = vld [vmem:[#allocation10 + $0x28] sm:$0xff]   ;;  %v2698_v25 = vld [vmem:[#allocation10 + $0x30] sm:$0xff]   ;;  %v2699_v26 = vld [vmem:[#allocation10 + $0x38] sm:$0xff]  }
 0x4b1   : > { %2477 = vmatpush3.bf16.msra.mxu1 %v1358_v5  ;;  %v1349_v31 = vmax.f32 %v1341_v28, 0.0  ;;  %v1356_v38 = vmin.f32 %v1348_v33, 100.0  ;;  %2495 = vmatpush3.bf16.msra.mxu0 %v2693_v21 }
 0x4b2   : > { %2478 = vmatprep.subr.bf16.mxu1 %v1359_v1  ;;  %v1347_v32 = vmax.f32 %v1339_v0, 0.0  ;;  %v1354_v34 = vmin.f32 %v1346_v2, 100.0  ;;  %2496 = vmatprep.subr.bf16.mxu0 %v2694_v45 }
 0x4b3   : > { %v1357_v36 = vmin.f32 %v1349_v31, 100.0 }
 0x4b4   : > { %v1355_v35 = vmin.f32 %v1347_v32, 100.0 }
 0x4b5   : > { %2479 = vmatpush3.bf16.msra.mxu1 %v1359_v1  ;;  %v1361_v39 = vpack.c.bf16 %v1357_v36, %v1356_v38  ;;  %2497 = vmatpush3.bf16.msra.mxu0 %v2694_v45 }
 0x4b6   : > { %v1360_v37 = vpack.c.bf16 %v1355_v35, %v1354_v34  ;;  %2498 = vmatprep.subr.bf16.mxu0 %v2695_v9 }
 0x4b8   : > { %2480 = vmatprep.subr.bf16.mxu1 %v1360_v37 }
 0x4b9   : > { %2481 = vmatpush3.bf16.msra.mxu1 %v1360_v37  ;;  %2499 = vmatpush3.bf16.msra.mxu0 %v2695_v9 }
 0x4ba   : > { %2482 = vmatprep.subr.bf16.mxu1 %v1361_v39  ;;  %2500 = vmatprep.subr.bf16.mxu0 %v2696_v23 }
 0x4bd   : > { %2483 = vmatpush3.bf16.msra.mxu1 %v1361_v39  ;;  %2501 = vmatpush3.bf16.msra.mxu0 %v2696_v23 }
 0x4be   : > { %2502 = vmatprep.subr.bf16.mxu0 %v2697_v24 }
 0x4c0   : > { %2485 = vmatmul.mubr.msk.bf16.vlgmr.msra.gmra.mrb[16].mxu1 %vm706_vm0, %v3535_v51 }
 0x4c1   : > { %2488 = vmatprep.mubr.msk.bf16.mxu1 %vm706_vm0, %v3538_v52  ;;  %2503 = vmatpush3.bf16.msra.mxu0 %v2697_v24 }
 0x4c2   : > { %2504 = vmatprep.subr.bf16.mxu0 %v2698_v25 }
 0x4c5   : > { %2505 = vmatpush3.bf16.msra.mxu0 %v2698_v25 }
 0x4c6   : > { %2506 = vmatprep.subr.bf16.mxu0 %v2699_v26 }
 0x4c8   : > { %2489 = vmatmul.mubr.msk.bf16.gmra.mrb[20].mxu1 %vm706_vm0, %v3545_v53 }
 0x4c9   : > { %2507 = vmatpush3.bf16.msra.mxu0 %v2699_v26 }
 0x532   : > { %v3756_v5 = vpop.xlane.xlu0 %1495 }
 0x533   : > { %vm1523_vm0 = vcmp.eq.f32.partialorder %v3756_v5, inf  ;;  %vm1525_vm3 = vcmp.eq.f32.partialorder %v3756_v5, 0.0 }
 0x534   : > { %v1498_v28 = vpop.xlane.xlu1 %1497 }
 0x535   : > { %2750 = vrsqrt.f32 %v1498_v28  ;;  %vm1530_vm2 = vcmp.eq.f32.partialorder %v1498_v28, inf  ;;  %vm1532_vm5 = vcmp.eq.f32.partialorder %v1498_v28, 0.0 }
 0x536   : > { %v3758_v0 = vpop.xlane.xlu0 %1491  ;;  %2752 = vrsqrt.f32 %v3756_v5 }
 0x537   : > { %2754 = vrsqrt.f32 %v3758_v0  ;;  %vm1509_vm4 = vcmp.eq.f32.partialorder %v3758_v0, inf  ;;  %vm1511_vm6 = vcmp.eq.f32.partialorder %v3758_v0, 0.0 }
 0x538   : > { %v3760_v1 = vpop.xlane.xlu1 %1493 }
 0x539   : > { %2756 = vrsqrt.f32 %v3760_v1  ;;  %vm1516_vm7 = vcmp.eq.f32.partialorder %v3760_v1, inf  ;;  %vm1518_vm8 = vcmp.eq.f32.partialorder %v3760_v1, 0.0 }
 0x53b   : > { %v3763_v2 = vpop.xlane.xlu0 %1499 }
 0x53c   : > { %2758 = vrsqrt.f32 %v3763_v2  ;;  %vm1537_vm9 = vcmp.eq.f32.partialorder %v3763_v2, inf  ;;  %vm1539_vm10 = vcmp.eq.f32.partialorder %v3763_v2, 0.0 }
 0x53d   : > { %v3766_v31 = vpop.xlane.xlu1 %1501 }
 0x53e   : > { %vm1544_vm11 = vcmp.eq.f32.partialorder %v3766_v31, inf  ;;  %vm1546_vm13 = vcmp.eq.f32.partialorder %v3766_v31, 0.0 }
 0x53f   : > { %v2751_v37 = vpop.eup %2750 }
 0x540   : > { %v2753_v39 = vpop.eup %2752 }
 0x593   : > { %v2486_v44 = vpop.f32.mrb[16].mxu1 }
 0x594   : > { %v1429_v12 = vmax.f32 %v2486_v44, 0.0  ;;  %v1396_v48 = vpop.f32.mrb[17].mxu1  ;;  %v2755_v44 = vpop.eup %2754 }
 0x595   : > { %v1427_v27 = vmax.f32 %v1396_v48, 0.0  ;;  %v2487_v7 = vpop.f32.mrb[18].mxu1  ;;  %v1529_v48 = vmul.f32 %v2751_v37, %v1498_v28 }
 0x596   : > { %v3720_v8 = vmin.f32 %v1429_v12, 100.0  ;;  %v1430_v29 = vmax.f32 %v2487_v7, 0.0  ;;  %v1399_v13 = vpop.f32.mrb[19].mxu1  ;;  %v2757_v7 = vpop.eup %2756 }
 0x597   : > { %v1428_v14 = vmax.f32 %v1399_v13, 0.0  ;;  %v3722_v51 = vmin.f32 %v1427_v27, 100.0  ;;  %v1508_v13 = vmul.f32 %v2755_v44, %v3758_v0 }
 0x598   : > { %v3724_v30 = vmin.f32 %v1430_v29, 100.0  ;;  %v1445_v52 = vmul.f32 %v3720_v8, %v3720_v8  ;;  %v1522_v29 = vmul.f32 %v2753_v39, %v3756_v5 }
 0x599   : > { %v3728_v53 = vmin.f32 %v1428_v14, 100.0  ;;  %v1443_v54 = vmul.f32 %v3722_v51, %v3722_v51 }
 0x59a   : > { %1455 = vadd.xlane.f32.xlu0 %v1445_v52  ;;  %v1446_v15 = vmul.f32 %v3724_v30, %v3724_v30  ;;  %v1526_v52 = vand.u32 2147483648, %v3756_v5 }
 0x59b   : > { %v2490_v49 = vpop.f32.mrb[20].mxu1  ;;  %v1444_v42 = vmul.f32 %v3728_v53, %v3728_v53 }
 0x59c   : > { %1457 = vadd.xlane.f32.xlu1 %v1446_v15  ;;  %v1412_v50 = vpop.f32.mrb[21].mxu1  ;;  %v1433_v61 = vmax.f32 %v2490_v49, 0.0  ;;  %v1531_v15 = vsel %vm1530_vm2, %v1498_v28, %v1529_v48  ;;  %v1515_v49 = vmul.f32 %v2757_v7, %v3760_v1  ;;  %v1540_v48 = vand.u32 2147483648, %v3763_v2 }
 0x59d   : > { %v1431_v55 = vmax.f32 %v1412_v50, 0.0  ;;  %v2491_v56 = vpop.f32.mrb[22].mxu1 }
 0x59e   : > { %1451 = vadd.xlane.f32.xlu0 %v1443_v54  ;;  %v1415_v57 = vpop.f32.mrb[23].mxu1  ;;  %v1434_v6 = vmax.f32 %v2491_v56, 0.0  ;;  %v3746_v16 = vmin.f32 %v1433_v61, 100.0  ;;  %v2759_v54 = vpop.eup %2758  ;;  %v1533_v56 = vand.u32 2147483648, %v1498_v28  ;;  %v1512_v61 = vand.u32 2147483648, %v3758_v0 }
 0x59f   : > { %v3736_v58 = vmin.f32 %v1431_v55, 100.0  ;;  %v1432_v59 = vmax.f32 %v1415_v57, 0.0  ;;  %v1524_v55 = vsel %vm1523_vm0, %v3756_v5, %v1522_v29  ;;  %v1536_v28 = vmul.f32 %v2759_v54, %v3763_v2 }
 0x5a0   : > { %1453 = vadd.xlane.f32.xlu1 %v1444_v42  ;;  %v3748_v17 = vmin.f32 %v1434_v6, 100.0  ;;  %v1449_v60 = vmul.f32 %v3746_v16, %v3746_v16  ;;  %v1527_v21 = vsel %vm1525_vm3, %v1526_v52, %v1524_v55 }
 0x5a1   : > { %v3740_v10 = vmin.f32 %v1432_v59, 100.0  ;;  %v1447_v43 = vmul.f32 %v3736_v58, %v3736_v58  ;;  %v1510_v59 = vsel %vm1509_vm4, %v3758_v0, %v1508_v13  ;;  %v1538_v44 = vsel %vm1537_vm9, %v3763_v2, %v1536_v28  ;;  %v2712_v28 = vld [vmem:[#allocation13 + $0x20] sm:$0xff]  }
 0x5a2   : > { %1503 = vadd.xlane.f32.xlu0 %v1489_v41  ;;  %v1450_v20 = vmul.f32 %v3748_v17, %v3748_v17  ;;  %v1513_v26 = vsel %vm1511_vm6, %v1512_v61, %v1510_v59  ;;  %v1541_v2 = vsel %vm1539_vm10, %v1540_v48, %v1538_v44 }
 0x5a3   : > { %v1448_v18 = vmul.f32 %v3740_v10, %v3740_v10 }
 0x5a4   : > { %1505 = vadd.xlane.f32.xlu1 %v1490_v4  ;;  %v1534_v4 = vsel %vm1532_vm5, %v1533_v56, %v1531_v15  ;;  %v1547_v15 = vand.u32 2147483648, %v3766_v31 }
 0x5a6   : > { %1459 = vadd.xlane.f32.xlu0 %v1447_v43 }
 0x5a8   : > { %1461 = vadd.xlane.f32.xlu1 %v1448_v18 }
 0x5aa   : > { %1463 = vadd.xlane.f32.xlu0 %v1449_v60  ;;  %v1517_v60 = vsel %vm1516_vm7, %v3760_v1, %v1515_v49 }
 0x5ac   : > { %1465 = vadd.xlane.f32.xlu1 %v1450_v20  ;;  %v1519_v20 = vand.u32 2147483648, %v3760_v1 }
 0x627   : > { %v1456_v32 = vpop.xlane.xlu0 %1455 }
 0x628   : > { %v1469_v33 = vmax.f32 %v1456_v32, 1e-24 }
 0x629   : > { %v1458_v34 = vpop.xlane.xlu1 %1457 }
 0x62a   : > { %v1470_v35 = vmax.f32 %v1458_v34, 1e-24  ;;  %2760 = vrsqrt.f32 %v1469_v33 }
 0x62b   : > { %v1452_v36 = vpop.xlane.xlu0 %1451 }
 0x62c   : > { %2762 = vrsqrt.f32 %v1470_v35  ;;  %v1467_v38 = vmax.f32 %v1452_v36, 1e-24  ;;  %v1520_v36 = vsel %vm1518_vm8, %v1519_v20, %v1517_v60 }
 0x62d   : > { %2764 = vrsqrt.f32 %v3766_v31  ;;  %v1454_v22 = vpop.xlane.xlu1 %1453 }
 0x62e   : > { %2766 = vrsqrt.f32 %v1467_v38  ;;  %v1468_v12 = vmax.f32 %v1454_v22, 1e-24 }
 0x62f   : > { %v3771_v27 = vpop.xlane.xlu0 %1503 }
 0x630   : > { %2768 = vrsqrt.f32 %v1468_v12  ;;  %vm1551_vm12 = vcmp.eq.f32.partialorder %v3771_v27, inf  ;;  %v1554_v55 = vand.u32 2147483648, %v3771_v27  ;;  %vm1553_vm15 = vcmp.eq.f32.partialorder %v3771_v27, 0.0 }
 0x631   : > { %2770 = vrsqrt.f32 %v3771_v27  ;;  %v3776_v14 = vpop.xlane.xlu1 %1505 }
 0x632   : > { %2772 = vrsqrt.f32 %v3776_v14  ;;  %vm1558_vm14 = vcmp.eq.f32.partialorder %v3776_v14, inf  ;;  %vm1560_vm1 = vcmp.eq.f32.partialorder %v3776_v14, 0.0 }
 0x633   : > { %v1460_v50 = vpop.xlane.xlu0 %1459 }
 0x634   : > { %v1471_v57 = vmax.f32 %v1460_v50, 1e-24  ;;  %v2761_v42 = vpop.eup %2760 }
 0x635   : > { %v1462_v41 = vpop.xlane.xlu1 %1461  ;;  %v1565_v24 = vmul.f32 %v2761_v42, %v1527_v21  ;;  %v1561_v42 = vand.u32 2147483648, %v3776_v14 }
 0x636   : > { %v2763_v6 = vpop.eup %2762  ;;  %2774 = vrsqrt.f32 %v1471_v57  ;;  %v1472_v43 = vmax.f32 %v1462_v41, 1e-24 }
 0x637   : > { %v2765_v18 = vpop.eup %2764  ;;  %v1566_v45 = vmul.f32 %v2763_v6, %v1534_v4  ;;  %v1464_v9 = vpop.xlane.xlu0 %1463  ;;  %v1573_v1 = vmul.f32 %v1565_v24, %v3720_v8  ;;  %v2709_v24 = vld [vmem:[#allocation13 + $0x8] sm:$0xff]  }
 0x638   : > { %v2767_v23 = vpop.eup %2766  ;;  %2776 = vrsqrt.f32 %v1472_v43  ;;  %v1473_v25 = vmax.f32 %v1464_v9, 1e-24  ;;  %v1543_v38 = vmul.f32 %v2765_v18, %v3766_v31  ;;  %v2701_v9 = vld [vmem:[#allocation11 + $0x8] sm:$0xff]  }
 0x639   : > { %v1466_v32 = vpop.xlane.xlu1 %1465  ;;  %v1563_v33 = vmul.f32 %v2767_v23, %v1513_v26  ;;  %v1574_v35 = vmul.f32 %v1566_v45, %v3724_v30  ;;  %v2708_v23 = vld [vmem:[#allocation13] sm:$0xff]   ;;  %v2711_v26 = vld [vmem:[#allocation13 + $0x18] sm:$0xff]  }
 0x63a   : > { %v2769_v34 = vpop.eup %2768  ;;  %2778 = vrsqrt.f32 %v1473_v25  ;;  %v1474_v5 = vmax.f32 %v1466_v32, 1e-24  ;;  %v1545_v7 = vsel %vm1544_vm11, %v3766_v31, %v1543_v38  ;;  %2540 = vmatprep.subr.bf16.mxu0 %v2708_v23  ;;  %v2710_v25 = vld [vmem:[#allocation13 + $0x10] sm:$0xff]   ;;  %v2713_v32 = vld [vmem:[#allocation13 + $0x28] sm:$0xff]  }
 0x63b   : > { %v2771_v37 = vpop.eup %2770  ;;  %v1564_v39 = vmul.f32 %v2769_v34, %v1520_v36  ;;  %v1571_v22 = vmul.f32 %v1563_v33, %v3722_v51  ;;  %v1582_v51 = vadd.f32 %v1574_v35, %v3683_v40 }
 0x63c   : > { %v2773_v0 = vpop.eup %2772  ;;  %2780 = vrsqrt.f32 %v1474_v5  ;;  %v1550_v12 = vmul.f32 %v2771_v37, %v3771_v27 }
 0x63d   : > { %v1572_v30 = vmul.f32 %v1564_v39, %v3728_v53  ;;  %v1557_v29 = vmul.f32 %v2773_v0, %v3776_v14  ;;  %v1579_v8 = vadd.f32 %v1571_v22, %v3680_v63  ;;  %v1581_v53 = vadd.f32 %v1573_v1, %v3678_v46 }
 0x63e   : > { %v1552_v40 = vsel %vm1551_vm12, %v3771_v27, %v1550_v12 }
 0x63f   : > { %v1580_v13 = vadd.f32 %v1572_v30, %v3688_v47  ;;  %v1588_v63 = vpack.c.bf16 %v1582_v51, %v1581_v53  ;;  %v1548_v47 = vsel %vm1546_vm13, %v1547_v15, %v1545_v7  ;;  %v1559_v56 = vsel %vm1558_vm14, %v3776_v14, %v1557_v29 }
 0x640   : > { %v2775_v52 = vpop.eup %2774  ;;  %v1555_v59 = vsel %vm1553_vm15, %v1554_v55, %v1552_v40  ;;  %v1562_v4 = vsel %vm1560_vm1, %v1561_v42, %v1559_v56 }
 0x641   : > { %v1587_v49 = vpack.c.bf16 %v1580_v13, %v1579_v8  ;;  %v1567_v50 = vmul.f32 %v2775_v52, %v1541_v2 }
 0x642   : > { %v2777_v54 = vpop.eup %2776 }
 0x643   : > { %2508 = vmatprep.mubr.bf16.mxu0 %v1587_v49  ;;  %v1568_v46 = vmul.f32 %v2777_v54, %v1548_v47  ;;  %v1575_v57 = vmul.f32 %v1567_v50, %v3736_v58 }
 0x644   : > { %v2779_v31 = vpop.eup %2778  ;;  %2509 = vmatmul.mubr.bf16.vlgmr.msra.gmra.mrb[8].mxu0 %v1588_v63 }
 0x645   : > { %v1576_v61 = vmul.f32 %v1568_v46, %v3740_v10  ;;  %v1569_v41 = vmul.f32 %v2779_v31, %v1555_v59  ;;  %v1583_v27 = vadd.f32 %v1575_v57, %v3700_v11  ;;  %v2700_v10 = vld [vmem:[#allocation11] sm:$0xff]   ;;  %v2702_v11 = vld [vmem:[#allocation11 + $0x10] sm:$0xff]   ;;  %2541 = vmatpush3.bf16.msra.mxu0 %v2708_v23 }
 0x646   : > { %v2781_v6 = vpop.eup %2780  ;;  %2516 = vmatprep.subr.bf16.mxu1 %v2700_v10  ;;  %2542 = vmatprep.subr.bf16.mxu0 %v2709_v24 }
 0x647   : > { %v1584_v43 = vadd.f32 %v1576_v61, %v3706_v19  ;;  %v1570_v18 = vmul.f32 %v2781_v6, %v1562_v4  ;;  %v1577_v60 = vmul.f32 %v1569_v41, %v3746_v16  ;;  %2517 = vmatpush3.bf16.msra.mxu1 %v2700_v10  ;;  %v2703_v19 = vld [vmem:[#allocation11 + $0x18] sm:$0xff]   ;;  %v2704_v16 = vld [vmem:[#allocation11 + $0x20] sm:$0xff]  }
 0x648   : > { %2518 = vmatprep.subr.bf16.mxu1 %v2701_v9 }
 0x649   : > { %v1589_v58 = vpack.c.bf16 %v1584_v43, %v1583_v27  ;;  %v1578_v20 = vmul.f32 %v1570_v18, %v3748_v17  ;;  %v1585_v21 = vadd.f32 %v1577_v60, %v3698_v62  ;;  %v2705_v62 = vld [vmem:[#allocation11 + $0x28] sm:$0xff]   ;;  %v2706_v17 = vld [vmem:[#allocation11 + $0x30] sm:$0xff]   ;;  %2543 = vmatpush3.bf16.msra.mxu0 %v2709_v24 }
 0x64a   : > { %2544 = vmatprep.subr.bf16.mxu0 %v2710_v25 }
 0x64b   : > { %2512 = vmatprep.mubr.bf16.mxu0 %v1589_v58  ;;  %v1586_v14 = vadd.f32 %v1578_v20, %v3703_v3  ;;  %2519 = vmatpush3.bf16.msra.mxu1 %v2701_v9  ;;  %v2707_v3 = vld [vmem:[#allocation11 + $0x38] sm:$0xff]  }
 0x64c   : > { %2520 = vmatprep.subr.bf16.mxu1 %v2702_v11 }
 0x64d   : > { %v1590_v45 = vpack.c.bf16 %v1586_v14, %v1585_v21  ;;  %2545 = vmatpush3.bf16.msra.mxu0 %v2710_v25  ;;  %v2309_v25 = vld [vmem:[%s3962_s7] ss:$0 sm:$0xff] }
 0x64e   : > { %2546 = vmatprep.subr.bf16.mxu0 %v2711_v26 }
 0x64f   : > { %2513 = vmatmul.mubr.bf16.gmra.mrb[12].mxu0 %v1590_v45  ;;  %2521 = vmatpush3.bf16.msra.mxu1 %v2702_v11 }
 0x650   : > { %2522 = vmatprep.subr.bf16.mxu1 %v2703_v19 }
 0x651   : > { %2547 = vmatpush3.bf16.msra.mxu0 %v2711_v26 }
 0x652   : > { %2548 = vmatprep.subr.bf16.mxu0 %v2712_v28 }
 0x653   : > { %2523 = vmatpush3.bf16.msra.mxu1 %v2703_v19  ;;  %v2308_v19 = vld [vmem:[%s3961_s12] ss:$0 sm:$0xff]  ;;  %s3087_s12 = smov [#allocation14]  }
 0x654   : > { %2524 = vmatprep.subr.bf16.mxu1 %v2704_v16  ;;  %s2996_s14 = sshll.u32 %s3087_s12, 4  ;;  %s2997_s14 = int_to_ptr.vmem [resolvable:$false] %s2996_s14 }
 0x655   : > { %2549 = vmatpush3.bf16.msra.mxu0 %v2712_v28  ;;  %s2998_s28 = scalar_lea.vmem %s2997_s14, 2048 }
 0x656   : > { %2550 = vmatprep.subr.bf16.mxu0 %v2713_v32 }
 0x657   : > { %2525 = vmatpush3.bf16.msra.mxu1 %v2704_v16 }
 0x658   : > { %2526 = vmatprep.subr.bf16.mxu1 %v2705_v62 }
 0x659   : > { %2551 = vmatpush3.bf16.msra.mxu0 %v2713_v32 }
 0x65b   : > { %2527 = vmatpush3.bf16.msra.mxu1 %v2705_v62 }
 0x65c   : > { %2528 = vmatprep.subr.bf16.mxu1 %v2706_v17 }
 0x65f   : > { %2529 = vmatpush3.bf16.msra.mxu1 %v2706_v17 }
 0x660   : > { %2530 = vmatprep.subr.bf16.mxu1 %v2707_v3 }
 0x663   : > { %2531 = vmatpush3.bf16.msra.mxu1 %v2707_v3 }
 0x717   : > { %v2510_v33 = vpop.f32.mrb[8].mxu0 }
 0x718   : > { %v1673_v34 = vpop.f32.mrb[9].mxu0 }
 0x719   : > { %v2511_v35 = vpop.f32.mrb[10].mxu0 }
 0x71a   : > { %v1676_v5 = vpop.f32.mrb[11].mxu0 }
 0x71b   : > { %v1704_v36 = vadd.f32 %v1676_v5, %v1673_v34 }
 0x71d   : > { %v1705_v37 = vadd.f32 %v2510_v33, %v1704_v36 }
 0x71f   : > { %v1706_v38 = vadd.f32 %v2511_v35, %v1705_v37 }
 0x722   : > { %v2514_v39 = vpop.f32.mrb[12].mxu0 }
 0x723   : > { %v1689_v22 = vpop.f32.mrb[13].mxu0 }
 0x724   : > { %v1707_v0 = vadd.f32 %v1706_v38, %v1689_v22  ;;  %v2515_v1 = vpop.f32.mrb[14].mxu0 }
 0x725   : > { %v1692_v44 = vpop.f32.mrb[15].mxu0 }
 0x726   : > { %v1708_v12 = vadd.f32 %v1707_v0, %v1692_v44 }
 0x728   : > { %v1709_v30 = vadd.f32 %v2514_v39, %v1708_v12 }
 0x72a   : > { %v1710_v48 = vadd.f32 %v2515_v1, %v1709_v30 }
 0x72c   : > { %v1711_v51 = vrot.slane %v1710_v48, 4 }
 0x72e   : > { %v1712_v7 = vadd.f32 %v1711_v51, %v1710_v48 }
 0x730   : > { %v1713_v29 = vrot.slane %v1712_v7, 2 }
 0x732   : > { %v1714_v8 = vadd.f32 %v1713_v29, %v1712_v7 }
 0x734   : > { %v1715_v13 = vrot.slane %v1714_v8, 1 }
 0x736   : > { %v1716_v52 = vadd.f32 %v1715_v13, %v1714_v8 }
 0x738   : > { %v1717_v15 = vmul.f32 0.015625, %v1716_v52 }
 0x73a   : > { %v1718_v53 = vsub.f32 %v1673_v34, %v1717_v15  ;;  %v1719_v2 = vsub.f32 %v1676_v5, %v1717_v15  ;;  %v1720_v40 = vsub.f32 %v2510_v33, %v1717_v15  ;;  %v1721_v49 = vsub.f32 %v2511_v35, %v1717_v15 }
 0x73b   : > { %v1722_v50 = vsub.f32 %v1689_v22, %v1717_v15  ;;  %v1723_v54 = vsub.f32 %v1692_v44, %v1717_v15  ;;  %v1724_v55 = vsub.f32 %v2514_v39, %v1717_v15  ;;  %v1725_v63 = vsub.f32 %v2515_v1, %v1717_v15 }
 0x73c   : > { %v1726_v47 = vmul.f32 %v1718_v53, %v1718_v53  ;;  %v1727_v56 = vmul.f32 %v1719_v2, %v1719_v2  ;;  %v1728_v46 = vmul.f32 %v1720_v40, %v1720_v40  ;;  %v1729_v31 = vmul.f32 %v1721_v49, %v1721_v49 }
 0x73d   : > { %v1730_v59 = vmul.f32 %v1722_v50, %v1722_v50  ;;  %v1731_v41 = vmul.f32 %v1723_v54, %v1723_v54  ;;  %v1732_v4 = vmul.f32 %v1724_v55, %v1724_v55  ;;  %v1733_v43 = vmul.f32 %v1725_v63, %v1725_v63 }
 0x73e   : > { %v1734_v57 = vadd.f32 %v1727_v56, %v1726_v47  ;;  %v1756_v16 = vmul.f32 %v2308_v19, %v1720_v40  ;;  %v1759_v62 = vmul.f32 %v2308_v19, %v1723_v54  ;;  %v1754_v17 = vmul.f32 %v2308_v19, %v1718_v53  ;;  %v2310_v47 = vld [vmem:[%s3963_s18] ss:$0 sm:$0xff] }
 0x73f   : > { %v1755_v3 = vmul.f32 %v2308_v19, %v1719_v2  ;;  %v1757_v24 = vmul.f32 %v2308_v19, %v1721_v49  ;;  %v1758_v26 = vmul.f32 %v2308_v19, %v1722_v50  ;;  %v1760_v28 = vmul.f32 %v2308_v19, %v1724_v55  ;;  %v2714_v55 = vld [vmem:[#allocation13 + $0x30] sm:$0xff]  }
 0x740   : > { %v1735_v42 = vadd.f32 %v1734_v57, %v1728_v46  ;;  %v1761_v32 = vmul.f32 %v2308_v19, %v1725_v63  ;;  %2552 = vmatprep.subr.bf16.mxu0 %v2714_v55  ;;  %v2715_v63 = vld [vmem:[#allocation13 + $0x38] sm:$0xff]  }
 0x741   : > { %2553 = vmatpush3.bf16.msra.mxu0 %v2714_v55 }
 0x742   : > { %v1736_v61 = vadd.f32 %v1735_v42, %v1729_v31  ;;  %2554 = vmatprep.subr.bf16.mxu0 %v2715_v63 }
 0x744   : > { %v1737_v6 = vadd.f32 %v1736_v61, %v1730_v59 }
 0x745   : > { %2555 = vmatpush3.bf16.msra.mxu0 %v2715_v63 }
 0x746   : > { %v1738_v27 = vadd.f32 %v1737_v6, %v1731_v41  ;;  %v2784_v6 = vld [vmem:[%s3459_s2 + $0x10] sm:$0xff] }
 0x748   : > { %v1739_v18 = vadd.f32 %v1738_v27, %v1732_v4  ;;  %v2785_v27 = vld [vmem:[%s3459_s2 + $0x18] sm:$0xff] }
 0x74a   : > { %v1740_v60 = vadd.f32 %v1739_v18, %v1733_v43  ;;  %v2786_v18 = vld [vmem:[%s3459_s2] sm:$0xff] }
 0x74c   : > { %v1741_v58 = vrot.slane %v1740_v60, 4 }
 0x74e   : > { %v1742_v20 = vadd.f32 %v1741_v58, %v1740_v60  ;;  %v2787_v58 = vld [vmem:[%s3459_s2 + $0x8] sm:$0xff] }
 0x750   : > { %v1743_v21 = vrot.slane %v1742_v20, 2 }
 0x752   : > { %v1744_v14 = vadd.f32 %v1743_v21, %v1742_v20 }
 0x754   : > { %v1745_v45 = vrot.slane %v1744_v14, 1 }
 0x756   : > { %v1746_v10 = vadd.f32 %v1745_v45, %v1744_v14 }
 0x758   : > { %v1747_v9 = vmul.f32 0.015625, %v1746_v10 }
 0x75a   : > { %v1762_v11 = vadd.f32 1e-05, %v1747_v9 }
 0x75c   : > { %2782 = vrsqrt.f32 %v1762_v11 }
 0x766   : > { %v2783_v23 = vpop.eup %2782 }
 0x767   : > { %v1769_v33 = vmul.f32 %v2783_v23, %v1759_v62  ;;  %v1764_v34 = vmul.f32 %v2783_v23, %v1754_v17  ;;  %v1765_v35 = vmul.f32 %v2783_v23, %v1755_v3  ;;  %v1766_v5 = vmul.f32 %v2783_v23, %v1756_v16  ;;  %v2788_v3 = vld [vmem:[%s3459_s2 + $0x30] sm:$0xff] }
 0x768   : > { %v1767_v36 = vmul.f32 %v2783_v23, %v1757_v24  ;;  %v1768_v37 = vmul.f32 %v2783_v23, %v1758_v26  ;;  %v1770_v38 = vmul.f32 %v2783_v23, %v1760_v28  ;;  %v1771_v39 = vmul.f32 %v2783_v23, %v1761_v32  ;;  %v2789_v24 = vld [vmem:[%s3459_s2 + $0x38] sm:$0xff]  ;;  %v2790_v26 = vld [vmem:[%s3459_s2 + $0x20] sm:$0xff]  ;;  %v2791_v32 = vld [vmem:[%s3459_s2 + $0x28] sm:$0xff]  ;;  %s597_s2 = scalar_lea.vmem [#allocation14], %s2261_s13  ;;  %s2335_s13 = sshll.u32 %s3186_s19, 10 }
 0x769   : > { %v1778_v22 = vadd.f32 %v2309_v25, %v1764_v34  ;;  %v1779_v0 = vadd.f32 %v2309_v25, %v1765_v35  ;;  %v1780_v1 = vadd.f32 %v2309_v25, %v1766_v5  ;;  %v1783_v44 = vadd.f32 %v2309_v25, %v1769_v33  ;;  %v2319_v5 = vld [vmem:[%s3964_s0] ss:$0 sm:$0xff]  ;;  %s2103_s5 = sshll.u32 %s597_s2, 4  ;;  %s3860_s22 = scalar_lea.hbm %s3965_s26, %s2335_s13  ;;  %s3855_s5 = int_to_ptr.vmem [resolvable:$true] %s2103_s5 }
 0x76a   : > { %v1781_v12 = vadd.f32 %v2309_v25, %v1767_v36  ;;  %v1782_v30 = vadd.f32 %v2309_v25, %v1768_v37  ;;  %v1784_v48 = vadd.f32 %v2309_v25, %v1770_v38  ;;  %v1785_v51 = vadd.f32 %v2309_v25, %v1771_v39  ;;  %s2090_s19 = scalar_lea.sflag [#allocation4], %s3453_s24  ;;  %s2992_s25 = scalar_lea.vmem %s3855_s5, 1024 }
 0x76b   : > { %v1786_v7 = vmax.f32 %v1778_v22, 0.0  ;;  %v1787_v29 = vmax.f32 %v1779_v0, 0.0  ;;  %v1788_v8 = vmax.f32 %v1780_v1, 0.0  ;;  %v1791_v13 = vmax.f32 %v1783_v44, 0.0  ;;  %p2993_p7 = scmp.ne.s32.totalorder %s3855_s5, %s2992_s25  ;;  %p2999_p5 = scmp.lt.s32.totalorder %s3855_s5, %s2997_s14 }
 0x76c   : > { %v1789_v52 = vmax.f32 %v1781_v12, 0.0  ;;  %v1790_v15 = vmax.f32 %v1782_v30, 0.0  ;;  %v1792_v53 = vmax.f32 %v1784_v48, 0.0  ;;  %v1793_v2 = vmax.f32 %v1785_v51, 0.0  ;;  %p3000_p9 = scmp.lt.s32.totalorder %s2998_s28, %s2992_s25 }
 0x76d   : > { %v1794_v40 = vpack.c.bf16 %v1787_v29, %v1786_v7  ;;  %p2994_p6 = pnand %p2993_p7, %p3966_p2 }
 0x76e   : > { %v1795_v49 = vpack.c.bf16 %v1789_v52, %v1788_v8  ;;  %v1796_v50 = vpack.c.bf16 %v1791_v13, %v1790_v15  ;;  %v1797_v54 = vpack.c.bf16 %v1793_v2, %v1792_v53  ;;  %p3001_p4 = por %p3000_p9, %p2999_p5 }
 0x76f   : > { %2532 = vmatprep.mubr.bf16.mxu1 %v1794_v40  ;;  %p2995_p10 = pneg %p2994_p6 }
 0x770   : > { %2533 = vmatmul.mubr.bf16.vlgmr.msra.gmra.mrb[24].mxu1 %v1795_v49 }
 0x771   : > { %2536 = vmatprep.mubr.bf16.mxu1 %v1796_v50  ;;  %p3002_p8 = pnand %p3001_p4, %p2995_p10 }
 0x778   : > { %2537 = vmatmul.mubr.bf16.gmra.mrb[28].mxu1 %v1797_v54 }
 0x843   : > { %v2534_v56 = vpop.f32.mrb[24].mxu1 }
 0x844   : > { %v1895_v46 = vadd.f32 %v2534_v56, %v2310_v47  ;;  %v1886_v57 = vpop.f32.mrb[25].mxu1 }
 0x845   : > { %v1887_v31 = vadd.f32 %v2310_v47, %v1886_v57  ;;  %v2535_v42 = vpop.f32.mrb[26].mxu1 }
 0x846   : > { %v1898_v59 = vadd.f32 %v2535_v42, %v2310_v47  ;;  %v1889_v61 = vpop.f32.mrb[27].mxu1  ;;  %v1919_v4 = vadd.f32 %v2784_v6, %v1895_v46 }
 0x847   : > { %v1890_v41 = vadd.f32 %v2310_v47, %v1889_v61  ;;  %v1917_v60 = vadd.f32 %v2786_v18, %v1887_v31 }
 0x848   : > { %v1920_v43 = vadd.f32 %v2785_v27, %v1898_v59 }
 0x849   : > { %v1918_v20 = vadd.f32 %v2787_v58, %v1890_v41 }
 0x84a   : > { %v1926_v21 = vpack.c.bf16 %v1920_v43, %v1919_v4 }
 0x84b   : > { %v2538_v14 = vpop.f32.mrb[28].mxu1  ;;  %v1925_v45 = vpack.c.bf16 %v1918_v20, %v1917_v60 }
 0x84c   : > { %v1911_v10 = vadd.f32 %v2538_v14, %v2310_v47  ;;  %v1902_v9 = vpop.f32.mrb[29].mxu1 }
 0x84d   : > { %v1903_v11 = vadd.f32 %v2310_v47, %v1902_v9  ;;  %v2539_v19 = vpop.f32.mrb[30].mxu1  ;;  %2556 = vmatprep.mubr.bf16.mxu0 %v1925_v45 }
 0x84e   : > { %v1914_v16 = vadd.f32 %v2539_v19, %v2310_v47  ;;  %v1905_v62 = vpop.f32.mrb[31].mxu1  ;;  %2557 = vmatmul.mubr.bf16.vlgmr.msra.gmra.mrb[16].mxu0 %v1926_v21  ;;  %v1923_v23 = vadd.f32 %v2788_v3, %v1911_v10 }
 0x84f   : > { %v1906_v17 = vadd.f32 %v2310_v47, %v1905_v62  ;;  %v1921_v28 = vadd.f32 %v2790_v26, %v1903_v11 }
 0x850   : > { %v1924_v25 = vadd.f32 %v2789_v24, %v1914_v16 }
 0x851   : > { %v1922_v33 = vadd.f32 %v2791_v32, %v1906_v17 }
 0x852   : > { %v1928_v34 = vpack.c.bf16 %v1924_v25, %v1923_v23 }
 0x853   : > { %v1927_v35 = vpack.c.bf16 %v1922_v33, %v1921_v28 }
 0x855   : > { %2560 = vmatprep.mubr.bf16.mxu0 %v1927_v35 }
 0x856   : > { %2561 = vmatmul.mubr.bf16.gmra.mrb[20].mxu0 %v1928_v34 }
 0x921   : > { %v2558_v36 = vpop.f32.mrb[16].mxu0 }
 0x922   : > { %v2043_v37 = vadd.f32 %v2558_v36, %v2319_v5  ;;  %v2034_v38 = vpop.f32.mrb[17].mxu0 }
 0x923   : > { %v2035_v39 = vadd.f32 %v2319_v5, %v2034_v38  ;;  %v2559_v22 = vpop.f32.mrb[18].mxu0 }
 0x924   : > { %v2067_v0 = vmax.f32 %v2043_v37, 0.0  ;;  %v2046_v1 = vadd.f32 %v2559_v22, %v2319_v5  ;;  %v2037_v44 = vpop.f32.mrb[19].mxu0 }
 0x925   : > { %v2065_v12 = vmax.f32 %v2035_v39, 0.0  ;;  %v2038_v30 = vadd.f32 %v2319_v5, %v2037_v44 }
 0x926   : > { %v2075_v48 = vadd.f32 1e-05, %v2067_v0  ;;  %v2068_v51 = vmax.f32 %v2046_v1, 0.0 }
 0x927   : > { %v2073_v7 = vadd.f32 1e-05, %v2065_v12  ;;  %v2066_v29 = vmax.f32 %v2038_v30, 0.0 }
 0x928   : > { %2083 = vst [vmem:[%s597_s2 + $0x10] sm:$0xff] %v2075_v48  ;;  %v2076_v8 = vadd.f32 1e-05, %v2068_v51 }
 0x929   : > { %2081 = vst [vmem:[%s597_s2] sm:$0xff] %v2073_v7  ;;  %v2074_v13 = vadd.f32 1e-05, %v2066_v29  ;;  %v2562_v52 = vpop.f32.mrb[20].mxu0 }
 0x92a   : > { %2084 = vst [vmem:[%s597_s2 + $0x18] sm:$0xff] %v2076_v8  ;;  %v2059_v15 = vadd.f32 %v2562_v52, %v2319_v5  ;;  %v2050_v53 = vpop.f32.mrb[21].mxu0 }
 0x92b   : > { %2082 = vst [vmem:[%s597_s2 + $0x8] sm:$0xff] %v2074_v13  ;;  %v2051_v2 = vadd.f32 %v2319_v5, %v2050_v53  ;;  %v2563_v40 = vpop.f32.mrb[22].mxu0 }
 0x92c   : > { %v2071_v49 = vmax.f32 %v2059_v15, 0.0  ;;  %v2062_v50 = vadd.f32 %v2563_v40, %v2319_v5  ;;  %v2053_v54 = vpop.f32.mrb[23].mxu0 }
 0x92d   : > { %v2069_v55 = vmax.f32 %v2051_v2, 0.0  ;;  %v2054_v63 = vadd.f32 %v2319_v5, %v2053_v54 }
 0x92e   : > { %v2079_v47 = vadd.f32 1e-05, %v2071_v49  ;;  %v2072_v56 = vmax.f32 %v2062_v50, 0.0 }
 0x92f   : > { %v2077_v46 = vadd.f32 1e-05, %v2069_v55  ;;  %v2070_v57 = vmax.f32 %v2054_v63, 0.0 }
 0x930   : > { %2087 = vst [vmem:[%s597_s2 + $0x30] sm:$0xff] %v2079_v47  ;;  %v2080_v31 = vadd.f32 1e-05, %v2072_v56 }
 0x931   : > { %2085 = vst [vmem:[%s597_s2 + $0x20] sm:$0xff] %v2077_v46  ;;  %v2078_v42 = vadd.f32 1e-05, %v2070_v57 }
 0x932   : > { %2088 = vst [vmem:[%s597_s2 + $0x38] sm:$0xff] %v2080_v31 }
 0x933   : > { %2086 = vst [vmem:[%s597_s2 + $0x28] sm:$0xff] %v2078_v42 }
 0x934   : > { %3005 = shalt.err (!%p3002_p8)
}
 0x935   : > { %s3006_s7 = scalar_lea.hbm %s3860_s22, 1024  ;;  %s3010_s18 = scalar_lea.hbm %s3965_s26, 2048 }
 0x936   : > { %p3007_p11 = scmp.ne.s32.totalorder %s3860_s22, %s3006_s7  ;;  %p3011_p1 = scmp.lt.u32.totalorder %s3860_s22, %s3965_s26 }
 0x937   : > { %p3012_p13 = scmp.lt.u32.totalorder %s3010_s18, %s3006_s7  ;;  %p3014_p7 = scmp.lt.u32.totalorder %s3006_s7, %s3860_s22 }
 0x938   : > { %p3008_p3 = pnand %p3007_p11, %p3966_p2 }
 0x939   : > { %p3013_p0 = por %p3012_p13, %p3011_p1 }
 0x93a   : > { %p3009_p12 = pneg %p3008_p3 }
 0x93b   : > { %p3015_p6 = por %p3014_p7, %p3013_p0 }
 0x93d   : > { %p3016_p10 = pnand %p3015_p6, %p3009_p12 }
 0x93f   : > { %3019 = shalt.err (!%p3016_p10)
}
 0x940   : > { %s3088_s0 = smov 128   ;;  %s3089_s2 = smov 8  }
 0x941   : > { %2588 = dma.vmem_to_hbm [thread:$0]  (%p3966_p2), %s3855_s5, 1024, %s3860_s22, %s2090_s19, %s3088_s0, %s3088_s0, %s3089_s2  }
 0x942 PF: > { %s2118_s13 = sand.u32 1, %s3062_s29   ;;  %p3967_p5 = scmp.ne.s32.totalorder %s3948_s17, 0 }
 0x943   : > { %p3968_p9 = scmp.ge.s32.totalorder %s3074_s16, 2  ;;  %s2119_s23 = scalar_lea.sflag [#allocation4], %s2118_s13 }
 0x945   : > { %p2614_p4 = pnand %p3968_p9, %p3967_p5 }
 0x947   : > { %3057 = dma.done.wait (!%p2614_p4), %s2119_s23, 1024  }
 0x948   : > { %3059 = vsyncadd (!%p2614_p4), %s2119_s23, 4294966272  ;;  %p32_p8 = scmp.ge.s32.totalorder %s3338_s21, 4   ;;  %s3969_s29 = smov %s3066_s30 }
 0x949   : > { %s3970_s30 = smov %s3070_s15  ;;  %s3971_s15 = smov %s3350_s8 }
 0x94a   : > { %s3972_s16 = smov %s3338_s21  ;;  %34 = sbr.rel (!%p32_p8) target bundleno = 22 (0x16), region = 154 }
 0x951   :  { %2124 = vsyncpa [#allocation3], 1 }
 0x952   :  { %2126 = vsyncpa [#allocation3 + $0x1], 1 }
 0x953   :  { %2127 = vsyncpa [#allocation6], 1 }
 0x954   :  { %2129 = vsyncpa [#allocation6 + $0x1], 1 }
 0x955   :  { %2130 = vsyncpa [#allocation9], 1 }
 0x956   :  { %2131 = vsyncpa [#allocation12], 1 }
 0x957   :  { %2132 = vsyncpa [#allocation4], 1 }
 0x958   :  { %2134 = vsyncpa [#allocation4 + $0x1], 1 }

</bundles_post_ra>
